<compile_context>
chip_gen: v6e
topology: v6e:2x2x1
jax: 0.10.0
libtpu: 0.0.40
codegen_flags: <defaults>
</compile_context>

<pallas_src>
import functools

import numpy as np

import jax
import jax.numpy as jnp
from jax.experimental import pallas as pl
from jax.experimental.pallas import tpu as pltpu

EPSILON = 1e-30


# --------------------------------------------------------------------------
# The single fused forward kernel
# --------------------------------------------------------------------------
def _graphvae_kernel(
    # inputs
    x_ref, enc_w_ref, enc_b_ref,
    bu_w1_ref, bu_b1_ref, bu_w2_ref, bu_b2_ref,
    td_w1q_ref, td_b1_ref, td_w2_ref, td_b2_ref,
    dec_w1_ref, dec_b1_ref, dec_w2_hbm_ref, dec_b2_ref,
    sel_ref, c_ref, eps_par_ref, eps_pri_ref, eps_pos_ref,
    # outputs
    pred_ref, zpost_ref, zprior_ref,
    # scratch
    dec_w2_vmem, dec_sem,
    *, N, D, batch, hidden):
    f32 = jnp.float32
    ND = N * D

    def dot(a, b):
        return jnp.dot(a, b, preferred_element_type=f32)

    # Kick off the decoder-weight DMA now; wait only right before it is used.
    dec_cp = pltpu.make_async_copy(dec_w2_hbm_ref, dec_w2_vmem, dec_sem.at[0])
    dec_cp.start()

    # ---------------- Encoder_BU:  relu(x @ W + b)  (bf16 MXU, f32 acc) ----
    h_enc = jnp.maximum(dot(x_ref[...], enc_w_ref[...]) + enc_b_ref[...], 0.0)

    # ---------------- Bottom-up MLPs: all N nodes in two matmuls -----------
    h_bu = jnp.maximum(dot(h_enc, bu_w1_ref[...]) + bu_b1_ref[...], 0.0)   # (b, N*hidden)
    bu_out = dot(h_bu, bu_w2_ref[...]) + bu_b2_ref[...]                    # (b, 2*N*D)
    mu_til = bu_out[:, :ND]                                                # lane-packed mu_tilde
    lv_til = bu_out[:, ND:]                                                # lane-packed logvar_tilde

    # ---------------- Top-down pass (fully unrolled, on-chip carry) --------
    # prior lists newest-first, exactly like the reference module.
    prior_mu = [jnp.zeros((batch, D), f32)]
    prior_std = [jnp.ones((batch, D), f32)]
    prior_prec = [jnp.ones((batch, D), f32)]      # exp(-logvar); base node: 1
    for j in range(N - 2, -1, -1):
        P = N - 1 - j
        eps_j = eps_par_ref[j]                                             # (b, (N-1)*D)
        # reparameterised parent samples, gated by concrete-relaxation c[j,p]
        scaled = [(prior_mu[p] + prior_std[p] * eps_j[:, p * D:(p + 1) * D])
                  * c_ref[j, p] for p in range(P)]

        acc = td_b1_ref[j]                                                 # (1, hidden)
        if P == 1:
            # torch's (1, b, D).view(b, D) is the identity.
            acc = acc + dot(scaled[0], td_w1q_ref[j, 0])
        else:
            # S stacks the parents along sublanes; the one-hot sel[j] matmul
            # reproduces torch's (P,b,D).view(b, P*D) row mixing in one shot.
            pieces = list(scaled)
            if P < N - 1:
                pieces.append(jnp.zeros(((N - 1 - P) * batch, D), f32))
            S = jnp.concatenate(pieces, axis=0)                            # ((N-1)*b, D)
            YS = dot(sel_ref[j], S)                                        # rows q*b:(q+1)*b = chunk q
            for q in range(P):
                acc = acc + dot(YS[q * batch:(q + 1) * batch],
                                td_w1q_ref[j, q])
        h1 = jnp.maximum(acc, 0.0)                                         # (b, hidden)
        out2 = dot(h1, td_w2_ref[j]) + td_b2_ref[j]                        # (b, 2D)
        mu_hat = out2[:, :D]
        lv_hat = out2[:, D:]
        prior_mu = [mu_hat] + prior_mu
        prior_std = [jnp.exp(0.5 * lv_hat)] + prior_std
        prior_prec = [jnp.exp(-lv_hat)] + prior_prec

    # ------- precision-weighted posterior + rsample + product over nodes ---
    eps_pri = eps_pri_ref[...]                                             # (b, N*D)
    eps_pos = eps_pos_ref[...]                                             # (b, N*D)
    z_prior = jnp.ones((batch, D), f32)
    z_post = jnp.ones((batch, D), f32)
    for i in range(N):
        pm, ps, p_prec = prior_mu[i], prior_std[i], prior_prec[i]
        mt = mu_til[:, i * D:(i + 1) * D]
        t_prec = jnp.exp(-lv_til[:, i * D:(i + 1) * D])                    # std_tilde ** -2
        var = 1.0 / (p_prec + t_prec)          # module's "std_i" (exact division)
        mu = var * (pm * p_prec + mt * t_prec)
        z_prior = z_prior * (pm + ps * eps_pri[:, i * D:(i + 1) * D])
        z_post = z_post * (mu + var * eps_pos[:, i * D:(i + 1) * D])
    zprior_ref[...] = z_prior
    zpost_ref[...] = z_post

    # ---------------- Decoder (with the module's `* 2 - 1` fused) ----------
    h_dec = jnp.maximum(dot(z_post, dec_w1_ref[...]) + dec_b1_ref[...], 0.0)
    dec_cp.wait()                                                          # dec_w2 now in VMEM
    logits = dot(h_dec.astype(dec_w2_vmem.dtype), dec_w2_vmem[...]) + dec_b2_ref[...]
    pred_ref[...] = jax.nn.sigmoid(logits) * 2.0 - 1.0


def _full_spec(arr):
    shape = tuple(arr.shape)

    def index_map():
        return (0,) * len(shape)

    return pl.BlockSpec(shape, index_map)


# --------------------------------------------------------------------------
# Parameters (same logical structure as the torch module) + packing
# --------------------------------------------------------------------------
def dense_init(key, fan_in, fan_out):
    w = jax.random.normal(key, (fan_in, fan_out), jnp.float32) / jnp.sqrt(
        jnp.float32(fan_in))
    b = jnp.zeros((fan_out,), jnp.float32)
    return w, b


def init_params(key, in_dim, hidden, N, D, out_dim):
    ks = iter(jax.random.split(key, 64))
    p = {}
    p["enc_w"], p["enc_b"] = dense_init(next(ks), in_dim, hidden)
    p["bu"] = []
    for _ in range(N):
        w1, b1 = dense_init(next(ks), hidden, hidden)
        w2, b2 = dense_init(next(ks), hidden, 2 * D)
        p["bu"].append(dict(w1=w1, b1=b1, w2=w2, b2=b2))
    p["td"] = []
    for j in range(N - 1):
        in_j = (N - 1 - j) * D
        w1, b1 = dense_init(next(ks), in_j, hidden)
        w2, b2 = dense_init(next(ks), hidden, 2 * D)
        p["td"].append(dict(w1=w1, b1=b1, w2=w2, b2=b2))
    p["dec_w1"], p["dec_b1"] = dense_init(next(ks), D, hidden)
    p["dec_w2"], p["dec_b2"] = dense_init(next(ks), hidden, out_dim)
    # nn.Parameter(torch.empty(N - i - 1, 1, 1).fill_(0.5))
    p["gating"] = [jnp.full((N - 1 - j, 1, 1), 0.5, jnp.float32)
                   for j in range(N - 1)]
    return p


def pack_params(p, N, D, hidden):
    """Repack per-layer params into the kernel-friendly layout (done once)."""
    ND = N * D
    packed = {}
    packed["enc_w"] = p["enc_w"].astype(jnp.bfloat16)          # big weight -> bf16
    packed["enc_b"] = p["enc_b"].reshape(1, -1)

    # bottom-up: wide layer-1 + ONE packed layer-2 (mu cols | logvar cols)
    packed["bu_w1"] = jnp.concatenate([p["bu"][i]["w1"] for i in range(N)], axis=1)
    packed["bu_b1"] = jnp.concatenate([p["bu"][i]["b1"] for i in range(N)]).reshape(1, -1)
    w2 = jnp.zeros((N * hidden, 2 * ND), jnp.float32)
    b2 = jnp.zeros((1, 2 * ND), jnp.float32)
    for i in range(N):
        w2 = w2.at[i * hidden:(i + 1) * hidden, i * D:(i + 1) * D].set(p["bu"][i]["w2"][:, :D])
        w2 = w2.at[i * hidden:(i + 1) * hidden, ND + i * D:ND + (i + 1) * D].set(p["bu"][i]["w2"][:, D:])
        b2 = b2.at[0, i * D:(i + 1) * D].set(p["bu"][i]["b2"][:D])
        b2 = b2.at[0, ND + i * D:ND + (i + 1) * D].set(p["bu"][i]["b2"][D:])
    packed["bu_w2"], packed["bu_b2"] = w2, b2

    # top-down: layer-1 split into per-chunk (D, hidden) slices indexed [j, q];
    # layer-2 packed as (hidden, 2D) per step (mu | logvar).
    td_w1q = jnp.zeros((N - 1, N - 1, D, hidden), jnp.float32)
    for j in range(N - 1):
        P = N - 1 - j
        for q in range(P):
            td_w1q = td_w1q.at[j, q].set(p["td"][j]["w1"][q * D:(q + 1) * D, :])
    packed["td_w1q"] = td_w1q
    packed["td_b1"] = jnp.stack([p["td"][j]["b1"].reshape(1, hidden) for j in range(N - 1)])
    packed["td_w2"] = jnp.stack([p["td"][j]["w2"] for j in range(N - 1)])        # (N-1, hidden, 2D)
    packed["td_b2"] = jnp.stack([p["td"][j]["b2"].reshape(1, 2 * D) for j in range(N - 1)])

    packed["dec_w1"] = p["dec_w1"]
    packed["dec_b1"] = p["dec_b1"].reshape(1, -1)
    packed["dec_w2"] = p["dec_w2"].astype(jnp.bfloat16)        # big weight -> bf16
    packed["dec_b2"] = p["dec_b2"].reshape(1, -1)
    return packed


def build_selectors(N, batch):
    """Per-step one-hot matrices reproducing torch's (P,b,D).view(b, P*D).

    sel[j] @ concat(parents, axis=0): rows q*batch..(q+1)*batch-1 of the
    result are chunk q of the torch 'view'-mixed tensor.
    """
    nb = (N - 1) * batch
    sel = np.zeros((N - 1, nb, nb), np.float32)
    for j in range(N - 1):
        P = N - 1 - j
        for q in range(P):
            for r in range(batch):
                sel[j, q * batch + r, r * P + q] = 1.0
    return jnp.asarray(sel)


# --------------------------------------------------------------------------
# Forward pass (single pallas_call inside one jit)
# --------------------------------------------------------------------------
@functools.partial(
    jax.jit,
    static_argnames=("N", "D", "hidden", "channels", "resolution"))
def graphvae_forward(packed, gating, sel, x, key, tau, *,
                     N, D, hidden, channels, resolution):
    b = x.shape[0]
    out_dim = channels * resolution * resolution
    x_flat = x.reshape(b, -1).astype(jnp.bfloat16)   # == torch x.view(b, -1)

    # ---- hoisted: concrete-relaxation gates + all sampling noise ----
    kg1, kg2, kpar, kpri, kpos = jax.random.split(key, 5)
    g1 = jax.random.gumbel(kg1, (N - 1, N - 1), jnp.float32)
    g2 = jax.random.gumbel(kg2, (N - 1, N - 1), jnp.float32)
    gate_rows = []
    for j in range(N - 1):
        P = N - 1 - j
        g = jnp.clip(gating[j].reshape((P,)), 0.0, 1.0)
        if P < N - 1:
            g = jnp.concatenate([g, jnp.full((N - 1 - P,), 0.5, jnp.float32)])
        gate_rows.append(g)
    gate = jnp.stack(gate_rows)                                  # (N-1, N-1)
    num = jnp.exp((g2 - g1) / tau)
    t1 = jnp.power(gate, 1.0 / tau)
    t2 = jnp.power(1.0 - gate, 1.0 / tau) * num
    c = t1 / (t1 + t2 + EPSILON)                                 # (N-1, N-1), SMEM scalars
    eps_par = jax.random.normal(kpar, (N - 1, b, (N - 1) * D), jnp.float32)
    eps_pri = jax.random.normal(kpri, (b, N * D), jnp.float32)
    eps_pos = jax.random.normal(kpos, (b, N * D), jnp.float32)

    inputs = (
        x_flat,
        packed["enc_w"], packed["enc_b"],
        packed["bu_w1"], packed["bu_b1"], packed["bu_w2"], packed["bu_b2"],
        packed["td_w1q"], packed["td_b1"], packed["td_w2"], packed["td_b2"],
        packed["dec_w1"], packed["dec_b1"], packed["dec_w2"], packed["dec_b2"],
        sel, c, eps_par, eps_pri, eps_pos,
    )
    in_specs = [
        _full_spec(x_flat),
        _full_spec(packed["enc_w"]), _full_spec(packed["enc_b"]),
        _full_spec(packed["bu_w1"]), _full_spec(packed["bu_b1"]),
        _full_spec(packed["bu_w2"]), _full_spec(packed["bu_b2"]),
        _full_spec(packed["td_w1q"]), _full_spec(packed["td_b1"]),
        _full_spec(packed["td_w2"]), _full_spec(packed["td_b2"]),
        _full_spec(packed["dec_w1"]), _full_spec(packed["dec_b1"]),
        pl.BlockSpec(memory_space=pl.ANY),                 # dec_w2 stays in HBM
        _full_spec(packed["dec_b2"]),
        _full_spec(sel),
        pl.BlockSpec(memory_space=pltpu.MemorySpace.SMEM),  # gate scalars
        _full_spec(eps_par), _full_spec(eps_pri), _full_spec(eps_pos),
    ]

    kernel = functools.partial(
        _graphvae_kernel, N=N, D=D, batch=b, hidden=hidden)

    pred, z_post, z_prior = pl.pallas_call(
        kernel,
        out_shape=(jax.ShapeDtypeStruct((b, out_dim), jnp.float32),
                   jax.ShapeDtypeStruct((b, D), jnp.float32),
                   jax.ShapeDtypeStruct((b, D), jnp.float32)),
        in_specs=in_specs,
        out_specs=(pl.BlockSpec((b, out_dim), lambda: (0, 0)),
                   pl.BlockSpec((b, D), lambda: (0, 0)),
                   pl.BlockSpec((b, D), lambda: (0, 0))),
        scratch_shapes=[pltpu.VMEM((hidden, out_dim), jnp.bfloat16),
                        pltpu.SemaphoreType.DMA((1,))],
    )(*inputs)

    pred_x = pred.reshape(b, channels, resolution, resolution)
    return pred_x, z_post, z_prior


# --------------------------------- main -------------------------------------
if __name__ == "__main__":
    N_nodes = 4          # number of latent nodes
    D = 4                # opt.dims_per_node
    M = N_nodes * D      # total latent dims
    channels = 4         # opt.channels
    resolution = 16      # opt.resolution
    batch = 8            # fills the 8 f32 sublanes of a vreg
    hidden = 32
    tau = 0.99 ** 0      # self.anneal() at epoch 0 -> tau = 1.0

    in_dim = channels * resolution * resolution
    out_dim = in_dim

    key = jax.random.PRNGKey(0)
    k_x, k_noise = jax.random.split(key, 2)
    x = jax.random.normal(k_x, (batch, channels, resolution, resolution),
                          jnp.float32)

    params = init_params(jax.random.PRNGKey(42), in_dim, hidden, N_nodes, D,
                         out_dim)
    packed = pack_params(params, N_nodes, D, hidden)
    sel = build_selectors(N_nodes, batch)

    pred_x, z_posterior, z_prior = graphvae_forward(
        packed, params["gating"], sel, x, k_noise, tau,
        N=N_nodes, D=D, hidden=hidden, channels=channels,
        resolution=resolution)

    pred_x = jax.block_until_ready(pred_x)
    z_posterior = jax.block_until_ready(z_posterior)
    z_prior = jax.block_until_ready(z_prior)

    assert pred_x.shape == (batch, channels, resolution, resolution)
    assert z_posterior.shape == (batch, D)
    assert z_prior.shape == (batch, D)
    assert bool(jnp.all(jnp.isfinite(pred_x)))
    assert bool(jnp.all(jnp.isfinite(z_posterior)))
    assert bool(jnp.all(jnp.isfinite(z_prior)))

    print("KERNEL_OK")
</pallas_src>

<mosaic_0001>
module attributes {stable_mosaic.version = 11 : i64} {
  func.func @_graphvae_kernel(%arg0: memref<8x1024xbf16, #tpu.memory_space<vmem>>, %arg1: memref<1024x32xbf16, #tpu.memory_space<vmem>>, %arg2: memref<1x32xf32, #tpu.memory_space<vmem>>, %arg3: memref<32x128xf32, #tpu.memory_space<vmem>>, %arg4: memref<1x128xf32, #tpu.memory_space<vmem>>, %arg5: memref<128x32xf32, #tpu.memory_space<vmem>>, %arg6: memref<1x32xf32, #tpu.memory_space<vmem>>, %arg7: memref<3x3x4x32xf32, #tpu.memory_space<vmem>>, %arg8: memref<3x1x32xf32, #tpu.memory_space<vmem>>, %arg9: memref<3x32x8xf32, #tpu.memory_space<vmem>>, %arg10: memref<3x1x8xf32, #tpu.memory_space<vmem>>, %arg11: memref<4x32xf32, #tpu.memory_space<vmem>>, %arg12: memref<1x32xf32, #tpu.memory_space<vmem>>, %arg13: memref<32x1024xbf16, #tpu.memory_space<any>>, %arg14: memref<1x1024xf32, #tpu.memory_space<vmem>>, %arg15: memref<3x24x24xf32, #tpu.memory_space<vmem>>, %arg16: memref<3x3xf32, #tpu.memory_space<smem>>, %arg17: memref<3x8x12xf32, #tpu.memory_space<vmem>>, %arg18: memref<8x16xf32, #tpu.memory_space<vmem>>, %arg19: memref<8x16xf32, #tpu.memory_space<vmem>>, %arg20: memref<8x1024xf32, #tpu.memory_space<vmem>>, %arg21: memref<8x4xf32, #tpu.memory_space<vmem>>, %arg22: memref<8x4xf32, #tpu.memory_space<vmem>>, %arg23: memref<32x1024xbf16, #tpu.memory_space<vmem>>, %arg24: memref<1x!tpu.dma_semaphore, #tpu.memory_space<semaphore_mem>>) attributes {dimension_semantics = [], scalar_prefetch = 0 : i64, scratch_operands = 2 : i64, tpu.core_type = #tpu.core_type<tc>} {
    %c0_i32 = arith.constant 0 : i32
    %0 = tpu.memref_slice %arg24[%c0_i32] : memref<1x!tpu.dma_semaphore, #tpu.memory_space<semaphore_mem>> -> memref<1x!tpu.dma_semaphore, #tpu.memory_space<semaphore_mem>>
    %1 = tpu.memref_squeeze %0 : memref<1x!tpu.dma_semaphore, #tpu.memory_space<semaphore_mem>> -> memref<!tpu.dma_semaphore, #tpu.memory_space<semaphore_mem>>
    tpu.enqueue_dma source(%arg13 : memref<32x1024xbf16, #tpu.memory_space<any>>) target(%arg23 : memref<32x1024xbf16, #tpu.memory_space<vmem>>) target_semaphore(%1 : memref<!tpu.dma_semaphore, #tpu.memory_space<semaphore_mem>>)
    %c0 = arith.constant 0 : index
    %c0_0 = arith.constant 0 : index
    %2 = vector.load %arg0[%c0, %c0_0] : memref<8x1024xbf16, #tpu.memory_space<vmem>>, vector<8x1024xbf16>
    %c0_1 = arith.constant 0 : index
    %c0_2 = arith.constant 0 : index
    %3 = vector.load %arg1[%c0_1, %c0_2] : memref<1024x32xbf16, #tpu.memory_space<vmem>>, vector<1024x32xbf16>
    %cst = arith.constant dense<0.000000e+00> : vector<8x32xf32>
    %4 = tpu.matmul %2, %3, %cst {dimension_numbers = #tpu.dot_dimension_numbers<[1], [0], [0], [1], [0, 0, 1, 1], [], []>} : vector<8x1024xbf16>, vector<1024x32xbf16>, vector<8x32xf32> -> vector<8x32xf32>
    %c0_3 = arith.constant 0 : index
    %c0_4 = arith.constant 0 : index
    %5 = vector.load %arg2[%c0_3, %c0_4] : memref<1x32xf32, #tpu.memory_space<vmem>>, vector<1x32xf32>
    %6 = vector.broadcast %5 : vector<1x32xf32> to vector<8x32xf32>
    %7 = arith.addf %4, %6 : vector<8x32xf32>
    %cst_5 = arith.constant 0.000000e+00 : f32
    %8 = vector.broadcast %cst_5 : f32 to vector<8x32xf32>
    %9 = arith.maximumf %7, %8 : vector<8x32xf32>
    %c0_6 = arith.constant 0 : index
    %c0_7 = arith.constant 0 : index
    %10 = vector.load %arg3[%c0_6, %c0_7] : memref<32x128xf32, #tpu.memory_space<vmem>>, vector<32x128xf32>
    %cst_8 = arith.constant dense<0.000000e+00> : vector<8x128xf32>
    %11 = tpu.matmul %9, %10, %cst_8 {dimension_numbers = #tpu.dot_dimension_numbers<[1], [0], [0], [1], [0, 0, 1, 1], [], []>} : vector<8x32xf32>, vector<32x128xf32>, vector<8x128xf32> -> vector<8x128xf32>
    %c0_9 = arith.constant 0 : index
    %c0_10 = arith.constant 0 : index
    %12 = vector.load %arg4[%c0_9, %c0_10] : memref<1x128xf32, #tpu.memory_space<vmem>>, vector<1x128xf32>
    %13 = vector.broadcast %12 : vector<1x128xf32> to vector<8x128xf32>
    %14 = arith.addf %11, %13 : vector<8x128xf32>
    %cst_11 = arith.constant 0.000000e+00 : f32
    %15 = vector.broadcast %cst_11 : f32 to vector<8x128xf32>
    %16 = arith.maximumf %14, %15 : vector<8x128xf32>
    %c0_12 = arith.constant 0 : index
    %c0_13 = arith.constant 0 : index
    %17 = vector.load %arg5[%c0_12, %c0_13] : memref<128x32xf32, #tpu.memory_space<vmem>>, vector<128x32xf32>
    %cst_14 = arith.constant dense<0.000000e+00> : vector<8x32xf32>
    %18 = tpu.matmul %16, %17, %cst_14 {dimension_numbers = #tpu.dot_dimension_numbers<[1], [0], [0], [1], [0, 0, 1, 1], [], []>} : vector<8x128xf32>, vector<128x32xf32>, vector<8x32xf32> -> vector<8x32xf32>
    %c0_15 = arith.constant 0 : index
    %c0_16 = arith.constant 0 : index
    %19 = vector.load %arg6[%c0_15, %c0_16] : memref<1x32xf32, #tpu.memory_space<vmem>>, vector<1x32xf32>
    %20 = vector.broadcast %19 : vector<1x32xf32> to vector<8x32xf32>
    %21 = arith.addf %18, %20 : vector<8x32xf32>
    %22 = vector.extract_strided_slice %21 {offsets = [0, 0], sizes = [8, 16], strides = [1, 1]} : vector<8x32xf32> to vector<8x16xf32>
    %23 = vector.extract_strided_slice %21 {offsets = [0, 16], sizes = [8, 16], strides = [1, 1]} : vector<8x32xf32> to vector<8x16xf32>
    %cst_17 = arith.constant 0.000000e+00 : f32
    %24 = vector.broadcast %cst_17 : f32 to vector<8x4xf32>
    %cst_18 = arith.constant 1.000000e+00 : f32
    %25 = vector.broadcast %cst_18 : f32 to vector<8x4xf32>
    %cst_19 = arith.constant 1.000000e+00 : f32
    %26 = vector.broadcast %cst_19 : f32 to vector<8x4xf32>
    %c2 = arith.constant 2 : index
    %c0_20 = arith.constant 0 : index
    %c0_21 = arith.constant 0 : index
    %27 = vector.load %arg17[%c2, %c0_20, %c0_21] : memref<3x8x12xf32, #tpu.memory_space<vmem>>, vector<1x8x12xf32>
    %28 = vector.shape_cast %27 : vector<1x8x12xf32> to vector<8x12xf32>
    %29 = vector.extract_strided_slice %28 {offsets = [0, 0], sizes = [8, 4], strides = [1, 1]} : vector<8x12xf32> to vector<8x4xf32>
    %30 = arith.mulf %25, %29 : vector<8x4xf32>
    %31 = arith.addf %24, %30 : vector<8x4xf32>
    %c2_22 = arith.constant 2 : index
    %c0_23 = arith.constant 0 : index
    %32 = memref.load %arg16[%c2_22, %c0_23] : memref<3x3xf32, #tpu.memory_space<smem>>
    %33 = vector.broadcast %32 : f32 to vector<8x4xf32>
    %34 = arith.mulf %31, %33 : vector<8x4xf32>
    %c2_24 = arith.constant 2 : index
    %c0_25 = arith.constant 0 : index
    %c0_26 = arith.constant 0 : index
    %35 = vector.load %arg8[%c2_24, %c0_25, %c0_26] : memref<3x1x32xf32, #tpu.memory_space<vmem>>, vector<1x1x32xf32>
    %36 = vector.shape_cast %35 : vector<1x1x32xf32> to vector<1x32xf32>
    %c2_27 = arith.constant 2 : index
    %c0_28 = arith.constant 0 : index
    %c0_29 = arith.constant 0 : index
    %c0_30 = arith.constant 0 : index
    %37 = vector.load %arg7[%c2_27, %c0_28, %c0_29, %c0_30] : memref<3x3x4x32xf32, #tpu.memory_space<vmem>>, vector<1x1x4x32xf32>
    %38 = vector.shape_cast %37 : vector<1x1x4x32xf32> to vector<4x32xf32>
    %cst_31 = arith.constant dense<0.000000e+00> : vector<8x32xf32>
    %39 = tpu.matmul %34, %38, %cst_31 {dimension_numbers = #tpu.dot_dimension_numbers<[1], [0], [0], [1], [0, 0, 1, 1], [], []>} : vector<8x4xf32>, vector<4x32xf32>, vector<8x32xf32> -> vector<8x32xf32>
    %40 = vector.broadcast %36 : vector<1x32xf32> to vector<8x32xf32>
    %41 = arith.addf %40, %39 : vector<8x32xf32>
    %cst_32 = arith.constant 0.000000e+00 : f32
    %42 = vector.broadcast %cst_32 : f32 to vector<8x32xf32>
    %43 = arith.maximumf %41, %42 : vector<8x32xf32>
    %c2_33 = arith.constant 2 : index
    %c0_34 = arith.constant 0 : index
    %c0_35 = arith.constant 0 : index
    %44 = vector.load %arg9[%c2_33, %c0_34, %c0_35] : memref<3x32x8xf32, #tpu.memory_space<vmem>>, vector<1x32x8xf32>
    %45 = vector.shape_cast %44 : vector<1x32x8xf32> to vector<32x8xf32>
    %cst_36 = arith.constant dense<0.000000e+00> : vector<8x8xf32>
    %46 = tpu.matmul %43, %45, %cst_36 {dimension_numbers = #tpu.dot_dimension_numbers<[1], [0], [0], [1], [0, 0, 1, 1], [], []>} : vector<8x32xf32>, vector<32x8xf32>, vector<8x8xf32> -> vector<8x8xf32>
    %c2_37 = arith.constant 2 : index
    %c0_38 = arith.constant 0 : index
    %c0_39 = arith.constant 0 : index
    %47 = vector.load %arg10[%c2_37, %c0_38, %c0_39] : memref<3x1x8xf32, #tpu.memory_space<vmem>>, vector<1x1x8xf32>
    %48 = vector.shape_cast %47 : vector<1x1x8xf32> to vector<1x8xf32>
    %49 = vector.broadcast %48 : vector<1x8xf32> to vector<8x8xf32>
    %50 = arith.addf %46, %49 : vector<8x8xf32>
    %51 = vector.extract_strided_slice %50 {offsets = [0, 0], sizes = [8, 4], strides = [1, 1]} : vector<8x8xf32> to vector<8x4xf32>
    %52 = vector.extract_strided_slice %50 {offsets = [0, 4], sizes = [8, 4], strides = [1, 1]} : vector<8x8xf32> to vector<8x4xf32>
    %cst_40 = arith.constant 5.000000e-01 : f32
    %53 = vector.broadcast %cst_40 : f32 to vector<8x4xf32>
    %54 = arith.mulf %53, %52 : vector<8x4xf32>
    %55 = math.exp %54 : vector<8x4xf32>
    %cst_41 = arith.constant 0.000000e+00 : f32
    %56 = vector.broadcast %cst_41 : f32 to vector<8x4xf32>
    %57 = arith.subf %56, %52 : vector<8x4xf32>
    %58 = math.exp %57 : vector<8x4xf32>
    %c1 = arith.constant 1 : index
    %c0_42 = arith.constant 0 : index
    %c0_43 = arith.constant 0 : index
    %59 = vector.load %arg17[%c1, %c0_42, %c0_43] : memref<3x8x12xf32, #tpu.memory_space<vmem>>, vector<1x8x12xf32>
    %60 = vector.shape_cast %59 : vector<1x8x12xf32> to vector<8x12xf32>
    %61 = vector.extract_strided_slice %60 {offsets = [0, 0], sizes = [8, 4], strides = [1, 1]} : vector<8x12xf32> to vector<8x4xf32>
    %62 = arith.mulf %55, %61 : vector<8x4xf32>
    %63 = arith.addf %51, %62 : vector<8x4xf32>
    %c1_44 = arith.constant 1 : index
    %c0_45 = arith.constant 0 : index
    %64 = memref.load %arg16[%c1_44, %c0_45] : memref<3x3xf32, #tpu.memory_space<smem>>
    %65 = vector.broadcast %64 : f32 to vector<8x4xf32>
    %66 = arith.mulf %63, %65 : vector<8x4xf32>
    %67 = vector.extract_strided_slice %60 {offsets = [0, 4], sizes = [8, 4], strides = [1, 1]} : vector<8x12xf32> to vector<8x4xf32>
    %68 = arith.mulf %25, %67 : vector<8x4xf32>
    %69 = arith.addf %24, %68 : vector<8x4xf32>
    %c1_46 = arith.constant 1 : index
    %c1_47 = arith.constant 1 : index
    %70 = memref.load %arg16[%c1_46, %c1_47] : memref<3x3xf32, #tpu.memory_space<smem>>
    %71 = vector.broadcast %70 : f32 to vector<8x4xf32>
    %72 = arith.mulf %69, %71 : vector<8x4xf32>
    %c1_48 = arith.constant 1 : index
    %c0_49 = arith.constant 0 : index
    %c0_50 = arith.constant 0 : index
    %73 = vector.load %arg8[%c1_48, %c0_49, %c0_50] : memref<3x1x32xf32, #tpu.memory_space<vmem>>, vector<1x1x32xf32>
    %74 = vector.shape_cast %73 : vector<1x1x32xf32> to vector<1x32xf32>
    %cst_51 = arith.constant 0.000000e+00 : f32
    %75 = vector.broadcast %cst_51 : f32 to vector<8x4xf32>
    %76 = tpu.concatenate %66, %72, %75 in 0 : vector<8x4xf32>, vector<8x4xf32>, vector<8x4xf32> -> vector<24x4xf32>
    %c1_52 = arith.constant 1 : index
    %c0_53 = arith.constant 0 : index
    %c0_54 = arith.constant 0 : index
    %77 = vector.load %arg15[%c1_52, %c0_53, %c0_54] : memref<3x24x24xf32, #tpu.memory_space<vmem>>, vector<1x24x24xf32>
    %78 = vector.shape_cast %77 : vector<1x24x24xf32> to vector<24x24xf32>
    %cst_55 = arith.constant dense<0.000000e+00> : vector<24x4xf32>
    %79 = tpu.matmul %78, %76, %cst_55 {dimension_numbers = #tpu.dot_dimension_numbers<[1], [0], [0], [1], [0, 0, 1, 1], [], []>} : vector<24x24xf32>, vector<24x4xf32>, vector<24x4xf32> -> vector<24x4xf32>
    %80 = vector.extract_strided_slice %79 {offsets = [0, 0], sizes = [8, 4], strides = [1, 1]} : vector<24x4xf32> to vector<8x4xf32>
    %c1_56 = arith.constant 1 : index
    %c0_57 = arith.constant 0 : index
    %c0_58 = arith.constant 0 : index
    %c0_59 = arith.constant 0 : index
    %81 = vector.load %arg7[%c1_56, %c0_57, %c0_58, %c0_59] : memref<3x3x4x32xf32, #tpu.memory_space<vmem>>, vector<1x1x4x32xf32>
    %82 = vector.shape_cast %81 : vector<1x1x4x32xf32> to vector<4x32xf32>
    %cst_60 = arith.constant dense<0.000000e+00> : vector<8x32xf32>
    %83 = tpu.matmul %80, %82, %cst_60 {dimension_numbers = #tpu.dot_dimension_numbers<[1], [0], [0], [1], [0, 0, 1, 1], [], []>} : vector<8x4xf32>, vector<4x32xf32>, vector<8x32xf32> -> vector<8x32xf32>
    %84 = vector.broadcast %74 : vector<1x32xf32> to vector<8x32xf32>
    %85 = arith.addf %84, %83 : vector<8x32xf32>
    %86 = vector.extract_strided_slice %79 {offsets = [8, 0], sizes = [8, 4], strides = [1, 1]} : vector<24x4xf32> to vector<8x4xf32>
    %c1_61 = arith.constant 1 : index
    %c1_62 = arith.constant 1 : index
    %c0_63 = arith.constant 0 : index
    %c0_64 = arith.constant 0 : index
    %87 = vector.load %arg7[%c1_61, %c1_62, %c0_63, %c0_64] : memref<3x3x4x32xf32, #tpu.memory_space<vmem>>, vector<1x1x4x32xf32>
    %88 = vector.shape_cast %87 : vector<1x1x4x32xf32> to vector<4x32xf32>
    %cst_65 = arith.constant dense<0.000000e+00> : vector<8x32xf32>
    %89 = tpu.matmul %86, %88, %cst_65 {dimension_numbers = #tpu.dot_dimension_numbers<[1], [0], [0], [1], [0, 0, 1, 1], [], []>} : vector<8x4xf32>, vector<4x32xf32>, vector<8x32xf32> -> vector<8x32xf32>
    %90 = arith.addf %85, %89 : vector<8x32xf32>
    %cst_66 = arith.constant 0.000000e+00 : f32
    %91 = vector.broadcast %cst_66 : f32 to vector<8x32xf32>
    %92 = arith.maximumf %90, %91 : vector<8x32xf32>
    %c1_67 = arith.constant 1 : index
    %c0_68 = arith.constant 0 : index
    %c0_69 = arith.constant 0 : index
    %93 = vector.load %arg9[%c1_67, %c0_68, %c0_69] : memref<3x32x8xf32, #tpu.memory_space<vmem>>, vector<1x32x8xf32>
    %94 = vector.shape_cast %93 : vector<1x32x8xf32> to vector<32x8xf32>
    %cst_70 = arith.constant dense<0.000000e+00> : vector<8x8xf32>
    %95 = tpu.matmul %92, %94, %cst_70 {dimension_numbers = #tpu.dot_dimension_numbers<[1], [0], [0], [1], [0, 0, 1, 1], [], []>} : vector<8x32xf32>, vector<32x8xf32>, vector<8x8xf32> -> vector<8x8xf32>
    %c1_71 = arith.constant 1 : index
    %c0_72 = arith.constant 0 : index
    %c0_73 = arith.constant 0 : index
    %96 = vector.load %arg10[%c1_71, %c0_72, %c0_73] : memref<3x1x8xf32, #tpu.memory_space<vmem>>, vector<1x1x8xf32>
    %97 = vector.shape_cast %96 : vector<1x1x8xf32> to vector<1x8xf32>
    %98 = vector.broadcast %97 : vector<1x8xf32> to vector<8x8xf32>
    %99 = arith.addf %95, %98 : vector<8x8xf32>
    %100 = vector.extract_strided_slice %99 {offsets = [0, 0], sizes = [8, 4], strides = [1, 1]} : vector<8x8xf32> to vector<8x4xf32>
    %101 = vector.extract_strided_slice %99 {offsets = [0, 4], sizes = [8, 4], strides = [1, 1]} : vector<8x8xf32> to vector<8x4xf32>
    %cst_74 = arith.constant 5.000000e-01 : f32
    %102 = vector.broadcast %cst_74 : f32 to vector<8x4xf32>
    %103 = arith.mulf %102, %101 : vector<8x4xf32>
    %104 = math.exp %103 : vector<8x4xf32>
    %cst_75 = arith.constant 0.000000e+00 : f32
    %105 = vector.broadcast %cst_75 : f32 to vector<8x4xf32>
    %106 = arith.subf %105, %101 : vector<8x4xf32>
    %107 = math.exp %106 : vector<8x4xf32>
    %c0_76 = arith.constant 0 : index
    %c0_77 = arith.constant 0 : index
    %c0_78 = arith.constant 0 : index
    %108 = vector.load %arg17[%c0_76, %c0_77, %c0_78] : memref<3x8x12xf32, #tpu.memory_space<vmem>>, vector<1x8x12xf32>
    %109 = vector.shape_cast %108 : vector<1x8x12xf32> to vector<8x12xf32>
    %110 = vector.extract_strided_slice %109 {offsets = [0, 0], sizes = [8, 4], strides = [1, 1]} : vector<8x12xf32> to vector<8x4xf32>
    %111 = arith.mulf %104, %110 : vector<8x4xf32>
    %112 = arith.addf %100, %111 : vector<8x4xf32>
    %c0_79 = arith.constant 0 : index
    %c0_80 = arith.constant 0 : index
    %113 = memref.load %arg16[%c0_79, %c0_80] : memref<3x3xf32, #tpu.memory_space<smem>>
    %114 = vector.broadcast %113 : f32 to vector<8x4xf32>
    %115 = arith.mulf %112, %114 : vector<8x4xf32>
    %116 = vector.extract_strided_slice %109 {offsets = [0, 4], sizes = [8, 4], strides = [1, 1]} : vector<8x12xf32> to vector<8x4xf32>
    %117 = arith.mulf %55, %116 : vector<8x4xf32>
    %118 = arith.addf %51, %117 : vector<8x4xf32>
    %c0_81 = arith.constant 0 : index
    %c1_82 = arith.constant 1 : index
    %119 = memref.load %arg16[%c0_81, %c1_82] : memref<3x3xf32, #tpu.memory_space<smem>>
    %120 = vector.broadcast %119 : f32 to vector<8x4xf32>
    %121 = arith.mulf %118, %120 : vector<8x4xf32>
    %122 = vector.extract_strided_slice %109 {offsets = [0, 8], sizes = [8, 4], strides = [1, 1]} : vector<8x12xf32> to vector<8x4xf32>
    %123 = arith.mulf %25, %122 : vector<8x4xf32>
    %124 = arith.addf %24, %123 : vector<8x4xf32>
    %c0_83 = arith.constant 0 : index
    %c2_84 = arith.constant 2 : index
    %125 = memref.load %arg16[%c0_83, %c2_84] : memref<3x3xf32, #tpu.memory_space<smem>>
    %126 = vector.broadcast %125 : f32 to vector<8x4xf32>
    %127 = arith.mulf %124, %126 : vector<8x4xf32>
    %c0_85 = arith.constant 0 : index
    %c0_86 = arith.constant 0 : index
    %c0_87 = arith.constant 0 : index
    %128 = vector.load %arg8[%c0_85, %c0_86, %c0_87] : memref<3x1x32xf32, #tpu.memory_space<vmem>>, vector<1x1x32xf32>
    %129 = vector.shape_cast %128 : vector<1x1x32xf32> to vector<1x32xf32>
    %130 = tpu.concatenate %115, %121, %127 in 0 : vector<8x4xf32>, vector<8x4xf32>, vector<8x4xf32> -> vector<24x4xf32>
    %c0_88 = arith.constant 0 : index
    %c0_89 = arith.constant 0 : index
    %c0_90 = arith.constant 0 : index
    %131 = vector.load %arg15[%c0_88, %c0_89, %c0_90] : memref<3x24x24xf32, #tpu.memory_space<vmem>>, vector<1x24x24xf32>
    %132 = vector.shape_cast %131 : vector<1x24x24xf32> to vector<24x24xf32>
    %cst_91 = arith.constant dense<0.000000e+00> : vector<24x4xf32>
    %133 = tpu.matmul %132, %130, %cst_91 {dimension_numbers = #tpu.dot_dimension_numbers<[1], [0], [0], [1], [0, 0, 1, 1], [], []>} : vector<24x24xf32>, vector<24x4xf32>, vector<24x4xf32> -> vector<24x4xf32>
    %134 = vector.extract_strided_slice %133 {offsets = [0, 0], sizes = [8, 4], strides = [1, 1]} : vector<24x4xf32> to vector<8x4xf32>
    %c0_92 = arith.constant 0 : index
    %c0_93 = arith.constant 0 : index
    %c0_94 = arith.constant 0 : index
    %c0_95 = arith.constant 0 : index
    %135 = vector.load %arg7[%c0_92, %c0_93, %c0_94, %c0_95] : memref<3x3x4x32xf32, #tpu.memory_space<vmem>>, vector<1x1x4x32xf32>
    %136 = vector.shape_cast %135 : vector<1x1x4x32xf32> to vector<4x32xf32>
    %cst_96 = arith.constant dense<0.000000e+00> : vector<8x32xf32>
    %137 = tpu.matmul %134, %136, %cst_96 {dimension_numbers = #tpu.dot_dimension_numbers<[1], [0], [0], [1], [0, 0, 1, 1], [], []>} : vector<8x4xf32>, vector<4x32xf32>, vector<8x32xf32> -> vector<8x32xf32>
    %138 = vector.broadcast %129 : vector<1x32xf32> to vector<8x32xf32>
    %139 = arith.addf %138, %137 : vector<8x32xf32>
    %140 = vector.extract_strided_slice %133 {offsets = [8, 0], sizes = [8, 4], strides = [1, 1]} : vector<24x4xf32> to vector<8x4xf32>
    %c0_97 = arith.constant 0 : index
    %c1_98 = arith.constant 1 : index
    %c0_99 = arith.constant 0 : index
    %c0_100 = arith.constant 0 : index
    %141 = vector.load %arg7[%c0_97, %c1_98, %c0_99, %c0_100] : memref<3x3x4x32xf32, #tpu.memory_space<vmem>>, vector<1x1x4x32xf32>
    %142 = vector.shape_cast %141 : vector<1x1x4x32xf32> to vector<4x32xf32>
    %cst_101 = arith.constant dense<0.000000e+00> : vector<8x32xf32>
    %143 = tpu.matmul %140, %142, %cst_101 {dimension_numbers = #tpu.dot_dimension_numbers<[1], [0], [0], [1], [0, 0, 1, 1], [], []>} : vector<8x4xf32>, vector<4x32xf32>, vector<8x32xf32> -> vector<8x32xf32>
    %144 = arith.addf %139, %143 : vector<8x32xf32>
    %145 = vector.extract_strided_slice %133 {offsets = [16, 0], sizes = [8, 4], strides = [1, 1]} : vector<24x4xf32> to vector<8x4xf32>
    %c0_102 = arith.constant 0 : index
    %c2_103 = arith.constant 2 : index
    %c0_104 = arith.constant 0 : index
    %c0_105 = arith.constant 0 : index
    %146 = vector.load %arg7[%c0_102, %c2_103, %c0_104, %c0_105] : memref<3x3x4x32xf32, #tpu.memory_space<vmem>>, vector<1x1x4x32xf32>
    %147 = vector.shape_cast %146 : vector<1x1x4x32xf32> to vector<4x32xf32>
    %cst_106 = arith.constant dense<0.000000e+00> : vector<8x32xf32>
    %148 = tpu.matmul %145, %147, %cst_106 {dimension_numbers = #tpu.dot_dimension_numbers<[1], [0], [0], [1], [0, 0, 1, 1], [], []>} : vector<8x4xf32>, vector<4x32xf32>, vector<8x32xf32> -> vector<8x32xf32>
    %149 = arith.addf %144, %148 : vector<8x32xf32>
    %cst_107 = arith.constant 0.000000e+00 : f32
    %150 = vector.broadcast %cst_107 : f32 to vector<8x32xf32>
    %151 = arith.maximumf %149, %150 : vector<8x32xf32>
    %c0_108 = arith.constant 0 : index
    %c0_109 = arith.constant 0 : index
    %c0_110 = arith.constant 0 : index
    %152 = vector.load %arg9[%c0_108, %c0_109, %c0_110] : memref<3x32x8xf32, #tpu.memory_space<vmem>>, vector<1x32x8xf32>
    %153 = vector.shape_cast %152 : vector<1x32x8xf32> to vector<32x8xf32>
    %cst_111 = arith.constant dense<0.000000e+00> : vector<8x8xf32>
    %154 = tpu.matmul %151, %153, %cst_111 {dimension_numbers = #tpu.dot_dimension_numbers<[1], [0], [0], [1], [0, 0, 1, 1], [], []>} : vector<8x32xf32>, vector<32x8xf32>, vector<8x8xf32> -> vector<8x8xf32>
    %c0_112 = arith.constant 0 : index
    %c0_113 = arith.constant 0 : index
    %c0_114 = arith.constant 0 : index
    %155 = vector.load %arg10[%c0_112, %c0_113, %c0_114] : memref<3x1x8xf32, #tpu.memory_space<vmem>>, vector<1x1x8xf32>
    %156 = vector.shape_cast %155 : vector<1x1x8xf32> to vector<1x8xf32>
    %157 = vector.broadcast %156 : vector<1x8xf32> to vector<8x8xf32>
    %158 = arith.addf %154, %157 : vector<8x8xf32>
    %159 = vector.extract_strided_slice %158 {offsets = [0, 0], sizes = [8, 4], strides = [1, 1]} : vector<8x8xf32> to vector<8x4xf32>
    %160 = vector.extract_strided_slice %158 {offsets = [0, 4], sizes = [8, 4], strides = [1, 1]} : vector<8x8xf32> to vector<8x4xf32>
    %cst_115 = arith.constant 5.000000e-01 : f32
    %161 = vector.broadcast %cst_115 : f32 to vector<8x4xf32>
    %162 = arith.mulf %161, %160 : vector<8x4xf32>
    %163 = math.exp %162 : vector<8x4xf32>
    %cst_116 = arith.constant 0.000000e+00 : f32
    %164 = vector.broadcast %cst_116 : f32 to vector<8x4xf32>
    %165 = arith.subf %164, %160 : vector<8x4xf32>
    %166 = math.exp %165 : vector<8x4xf32>
    %c0_117 = arith.constant 0 : index
    %c0_118 = arith.constant 0 : index
    %167 = vector.load %arg18[%c0_117, %c0_118] : memref<8x16xf32, #tpu.memory_space<vmem>>, vector<8x16xf32>
    %c0_119 = arith.constant 0 : index
    %c0_120 = arith.constant 0 : index
    %168 = vector.load %arg19[%c0_119, %c0_120] : memref<8x16xf32, #tpu.memory_space<vmem>>, vector<8x16xf32>
    %cst_121 = arith.constant 1.000000e+00 : f32
    %169 = vector.broadcast %cst_121 : f32 to vector<8x4xf32>
    %cst_122 = arith.constant 1.000000e+00 : f32
    %170 = vector.broadcast %cst_122 : f32 to vector<8x4xf32>
    %171 = vector.extract_strided_slice %22 {offsets = [0, 0], sizes = [8, 4], strides = [1, 1]} : vector<8x16xf32> to vector<8x4xf32>
    %172 = vector.extract_strided_slice %23 {offsets = [0, 0], sizes = [8, 4], strides = [1, 1]} : vector<8x16xf32> to vector<8x4xf32>
    %cst_123 = arith.constant 0.000000e+00 : f32
    %173 = vector.broadcast %cst_123 : f32 to vector<8x4xf32>
    %174 = arith.subf %173, %172 : vector<8x4xf32>
    %175 = math.exp %174 : vector<8x4xf32>
    %176 = arith.addf %166, %175 : vector<8x4xf32>
    %cst_124 = arith.constant 1.000000e+00 : f32
    %177 = vector.broadcast %cst_124 : f32 to vector<8x4xf32>
    %178 = arith.divf %177, %176 : vector<8x4xf32>
    %179 = arith.mulf %159, %166 : vector<8x4xf32>
    %180 = arith.mulf %171, %175 : vector<8x4xf32>
    %181 = arith.addf %179, %180 : vector<8x4xf32>
    %182 = arith.mulf %178, %181 : vector<8x4xf32>
    %183 = vector.extract_strided_slice %167 {offsets = [0, 0], sizes = [8, 4], strides = [1, 1]} : vector<8x16xf32> to vector<8x4xf32>
    %184 = arith.mulf %163, %183 : vector<8x4xf32>
    %185 = arith.addf %159, %184 : vector<8x4xf32>
    %186 = arith.mulf %169, %185 : vector<8x4xf32>
    %187 = vector.extract_strided_slice %168 {offsets = [0, 0], sizes = [8, 4], strides = [1, 1]} : vector<8x16xf32> to vector<8x4xf32>
    %188 = arith.mulf %178, %187 : vector<8x4xf32>
    %189 = arith.addf %182, %188 : vector<8x4xf32>
    %190 = arith.mulf %170, %189 : vector<8x4xf32>
    %191 = vector.extract_strided_slice %22 {offsets = [0, 4], sizes = [8, 4], strides = [1, 1]} : vector<8x16xf32> to vector<8x4xf32>
    %192 = vector.extract_strided_slice %23 {offsets = [0, 4], sizes = [8, 4], strides = [1, 1]} : vector<8x16xf32> to vector<8x4xf32>
    %cst_125 = arith.constant 0.000000e+00 : f32
    %193 = vector.broadcast %cst_125 : f32 to vector<8x4xf32>
    %194 = arith.subf %193, %192 : vector<8x4xf32>
    %195 = math.exp %194 : vector<8x4xf32>
    %196 = arith.addf %107, %195 : vector<8x4xf32>
    %cst_126 = arith.constant 1.000000e+00 : f32
    %197 = vector.broadcast %cst_126 : f32 to vector<8x4xf32>
    %198 = arith.divf %197, %196 : vector<8x4xf32>
    %199 = arith.mulf %100, %107 : vector<8x4xf32>
    %200 = arith.mulf %191, %195 : vector<8x4xf32>
    %201 = arith.addf %199, %200 : vector<8x4xf32>
    %202 = arith.mulf %198, %201 : vector<8x4xf32>
    %203 = vector.extract_strided_slice %167 {offsets = [0, 4], sizes = [8, 4], strides = [1, 1]} : vector<8x16xf32> to vector<8x4xf32>
    %204 = arith.mulf %104, %203 : vector<8x4xf32>
    %205 = arith.addf %100, %204 : vector<8x4xf32>
    %206 = arith.mulf %186, %205 : vector<8x4xf32>
    %207 = vector.extract_strided_slice %168 {offsets = [0, 4], sizes = [8, 4], strides = [1, 1]} : vector<8x16xf32> to vector<8x4xf32>
    %208 = arith.mulf %198, %207 : vector<8x4xf32>
    %209 = arith.addf %202, %208 : vector<8x4xf32>
    %210 = arith.mulf %190, %209 : vector<8x4xf32>
    %211 = vector.extract_strided_slice %22 {offsets = [0, 8], sizes = [8, 4], strides = [1, 1]} : vector<8x16xf32> to vector<8x4xf32>
    %212 = vector.extract_strided_slice %23 {offsets = [0, 8], sizes = [8, 4], strides = [1, 1]} : vector<8x16xf32> to vector<8x4xf32>
    %cst_127 = arith.constant 0.000000e+00 : f32
    %213 = vector.broadcast %cst_127 : f32 to vector<8x4xf32>
    %214 = arith.subf %213, %212 : vector<8x4xf32>
    %215 = math.exp %214 : vector<8x4xf32>
    %216 = arith.addf %58, %215 : vector<8x4xf32>
    %cst_128 = arith.constant 1.000000e+00 : f32
    %217 = vector.broadcast %cst_128 : f32 to vector<8x4xf32>
    %218 = arith.divf %217, %216 : vector<8x4xf32>
    %219 = arith.mulf %51, %58 : vector<8x4xf32>
    %220 = arith.mulf %211, %215 : vector<8x4xf32>
    %221 = arith.addf %219, %220 : vector<8x4xf32>
    %222 = arith.mulf %218, %221 : vector<8x4xf32>
    %223 = vector.extract_strided_slice %167 {offsets = [0, 8], sizes = [8, 4], strides = [1, 1]} : vector<8x16xf32> to vector<8x4xf32>
    %224 = arith.mulf %55, %223 : vector<8x4xf32>
    %225 = arith.addf %51, %224 : vector<8x4xf32>
    %226 = arith.mulf %206, %225 : vector<8x4xf32>
    %227 = vector.extract_strided_slice %168 {offsets = [0, 8], sizes = [8, 4], strides = [1, 1]} : vector<8x16xf32> to vector<8x4xf32>
    %228 = arith.mulf %218, %227 : vector<8x4xf32>
    %229 = arith.addf %222, %228 : vector<8x4xf32>
    %230 = arith.mulf %210, %229 : vector<8x4xf32>
    %231 = vector.extract_strided_slice %22 {offsets = [0, 12], sizes = [8, 4], strides = [1, 1]} : vector<8x16xf32> to vector<8x4xf32>
    %232 = vector.extract_strided_slice %23 {offsets = [0, 12], sizes = [8, 4], strides = [1, 1]} : vector<8x16xf32> to vector<8x4xf32>
    %cst_129 = arith.constant 0.000000e+00 : f32
    %233 = vector.broadcast %cst_129 : f32 to vector<8x4xf32>
    %234 = arith.subf %233, %232 : vector<8x4xf32>
    %235 = math.exp %234 : vector<8x4xf32>
    %236 = arith.addf %26, %235 : vector<8x4xf32>
    %cst_130 = arith.constant 1.000000e+00 : f32
    %237 = vector.broadcast %cst_130 : f32 to vector<8x4xf32>
    %238 = arith.divf %237, %236 : vector<8x4xf32>
    %239 = arith.mulf %24, %26 : vector<8x4xf32>
    %240 = arith.mulf %231, %235 : vector<8x4xf32>
    %241 = arith.addf %239, %240 : vector<8x4xf32>
    %242 = arith.mulf %238, %241 : vector<8x4xf32>
    %243 = vector.extract_strided_slice %167 {offsets = [0, 12], sizes = [8, 4], strides = [1, 1]} : vector<8x16xf32> to vector<8x4xf32>
    %244 = arith.mulf %25, %243 : vector<8x4xf32>
    %245 = arith.addf %24, %244 : vector<8x4xf32>
    %246 = arith.mulf %226, %245 : vector<8x4xf32>
    %247 = vector.extract_strided_slice %168 {offsets = [0, 12], sizes = [8, 4], strides = [1, 1]} : vector<8x16xf32> to vector<8x4xf32>
    %248 = arith.mulf %238, %247 : vector<8x4xf32>
    %249 = arith.addf %242, %248 : vector<8x4xf32>
    %250 = arith.mulf %230, %249 : vector<8x4xf32>
    %c0_131 = arith.constant 0 : index
    %c0_132 = arith.constant 0 : index
    %251 = vector.load %arg22[%c0_131, %c0_132] : memref<8x4xf32, #tpu.memory_space<vmem>>, vector<8x4xf32>
    tpu.vector_store %arg22[%c0_131, %c0_132], %246 {strides = array<i32>} : memref<8x4xf32, #tpu.memory_space<vmem>>, vector<8x4xf32>,
    %c0_133 = arith.constant 0 : index
    %c0_134 = arith.constant 0 : index
    %252 = vector.load %arg21[%c0_133, %c0_134] : memref<8x4xf32, #tpu.memory_space<vmem>>, vector<8x4xf32>
    tpu.vector_store %arg21[%c0_133, %c0_134], %250 {strides = array<i32>} : memref<8x4xf32, #tpu.memory_space<vmem>>, vector<8x4xf32>,
    %c0_135 = arith.constant 0 : index
    %c0_136 = arith.constant 0 : index
    %253 = vector.load %arg11[%c0_135, %c0_136] : memref<4x32xf32, #tpu.memory_space<vmem>>, vector<4x32xf32>
    %cst_137 = arith.constant dense<0.000000e+00> : vector<8x32xf32>
    %254 = tpu.matmul %250, %253, %cst_137 {dimension_numbers = #tpu.dot_dimension_numbers<[1], [0], [0], [1], [0, 0, 1, 1], [], []>} : vector<8x4xf32>, vector<4x32xf32>, vector<8x32xf32> -> vector<8x32xf32>
    %c0_138 = arith.constant 0 : index
    %c0_139 = arith.constant 0 : index
    %255 = vector.load %arg12[%c0_138, %c0_139] : memref<1x32xf32, #tpu.memory_space<vmem>>, vector<1x32xf32>
    %256 = vector.broadcast %255 : vector<1x32xf32> to vector<8x32xf32>
    %257 = arith.addf %254, %256 : vector<8x32xf32>
    %cst_140 = arith.constant 0.000000e+00 : f32
    %258 = vector.broadcast %cst_140 : f32 to vector<8x32xf32>
    %259 = arith.maximumf %257, %258 : vector<8x32xf32>
    %c0_i32_141 = arith.constant 0 : i32
    %260 = tpu.memref_slice %arg24[%c0_i32_141] : memref<1x!tpu.dma_semaphore, #tpu.memory_space<semaphore_mem>> -> memref<1x!tpu.dma_semaphore, #tpu.memory_space<semaphore_mem>>
    %261 = tpu.memref_squeeze %260 : memref<1x!tpu.dma_semaphore, #tpu.memory_space<semaphore_mem>> -> memref<!tpu.dma_semaphore, #tpu.memory_space<semaphore_mem>>
    tpu.wait_dma2 semaphore(%261 : memref<!tpu.dma_semaphore, #tpu.memory_space<semaphore_mem>>) src(%arg13 : memref<32x1024xbf16, #tpu.memory_space<any>>) dst(%arg23 : memref<32x1024xbf16, #tpu.memory_space<vmem>>)
    %262 = arith.truncf %259 : vector<8x32xf32> to vector<8x32xbf16>
    %c0_142 = arith.constant 0 : index
    %c0_143 = arith.constant 0 : index
    %263 = vector.load %arg23[%c0_142, %c0_143] : memref<32x1024xbf16, #tpu.memory_space<vmem>>, vector<32x1024xbf16>
    %cst_144 = arith.constant dense<0.000000e+00> : vector<8x1024xf32>
    %264 = tpu.matmul %262, %263, %cst_144 {dimension_numbers = #tpu.dot_dimension_numbers<[1], [0], [0], [1], [0, 0, 1, 1], [], []>} : vector<8x32xbf16>, vector<32x1024xbf16>, vector<8x1024xf32> -> vector<8x1024xf32>
    %c0_145 = arith.constant 0 : index
    %c0_146 = arith.constant 0 : index
    %265 = vector.load %arg14[%c0_145, %c0_146] : memref<1x1024xf32, #tpu.memory_space<vmem>>, vector<1x1024xf32>
    %266 = vector.broadcast %265 : vector<1x1024xf32> to vector<8x1024xf32>
    %267 = arith.addf %264, %266 : vector<8x1024xf32>
    %268 = arith.negf %267 : vector<8x1024xf32>
    %269 = math.exp %268 : vector<8x1024xf32>
    %cst_147 = arith.constant 1.000000e+00 : f32
    %270 = vector.broadcast %cst_147 : f32 to vector<8x1024xf32>
    %271 = arith.addf %270, %269 : vector<8x1024xf32>
    %272 = arith.divf %270, %271 : vector<8x1024xf32>
    %cst_148 = arith.constant 2.000000e+00 : f32
    %273 = vector.broadcast %cst_148 : f32 to vector<8x1024xf32>
    %274 = arith.mulf %272, %273 : vector<8x1024xf32>
    %cst_149 = arith.constant 1.000000e+00 : f32
    %275 = vector.broadcast %cst_149 : f32 to vector<8x1024xf32>
    %276 = arith.subf %274, %275 : vector<8x1024xf32>
    %c0_150 = arith.constant 0 : index
    %c0_151 = arith.constant 0 : index
    %277 = vector.load %arg20[%c0_150, %c0_151] : memref<8x1024xf32, #tpu.memory_space<vmem>>, vector<8x1024xf32>
    tpu.vector_store %arg20[%c0_150, %c0_151], %276 {strides = array<i32>} : memref<8x1024xf32, #tpu.memory_space<vmem>>, vector<8x1024xf32>,
    return
  }
}

</mosaic_0001>

<bundles_post_ra>
// kernel: graphvae_forward.3
= control target key start
LH: loop header
LB: loop body
LE: loop exit
PB: predicated region body
PF: predicated region fallthrough
CT: control target
= control target key end

     0   :  { %s4164_s0 = inlined_call_operand.vmem [shape: bf16[8,1024], index: 0, kind: input, shape index: {}]   ;;  %s4165_s1 = inlined_call_operand.vmem [shape: bf16[1024,32], index: 1, kind: input, shape index: {}]   ;;  %s4166_s2 = inlined_call_operand.vmem [shape: f32[1,32], index: 2, kind: input, shape index: {}]   ;;  %s4167_s3 = inlined_call_operand.vmem [shape: f32[32,128], index: 3, kind: input, shape index: {}]   ;;  %s4168_s4 = inlined_call_operand.vmem [shape: f32[1,128], index: 4, kind: input, shape index: {}]   ;;  %s4169_s5 = inlined_call_operand.vmem [shape: f32[128,32], index: 5, kind: input, shape index: {}]   ;;  %s4170_s6 = inlined_call_operand.vmem [shape: f32[1,32], index: 6, kind: input, shape index: {}]   ;;  %s4171_s7 = inlined_call_operand.vmem [shape: f32[3,3,4,32], index: 7, kind: input, shape index: {}]   ;;  %s4172_s8 = inlined_call_operand.vmem [shape: f32[3,1,32], index: 8, kind: input, shape index: {}]   ;;  %s4173_s9 = inlined_call_operand.vmem [shape: f32[3,32,8], index: 9, kind: input, shape index: {}]   ;;  %s4174_s10 = inlined_call_operand.vmem [shape: f32[3,1,8], index: 10, kind: input, shape index: {}]   ;;  %s4175_s11 = inlined_call_operand.vmem [shape: f32[4,32], index: 11, kind: input, shape index: {}]   ;;  %s4176_s12 = inlined_call_operand.vmem [shape: f32[1,32], index: 12, kind: input, shape index: {}]   ;;  %s4177_s13 = inlined_call_operand.vmem [shape: bf16[32,1024], index: 13, kind: input, shape index: {}]   ;;  %s4178_s14 = inlined_call_operand.vmem [shape: f32[1,1024], index: 14, kind: input, shape index: {}]   ;;  %s4179_s15 = inlined_call_operand.vmem [shape: f32[3,24,24], index: 15, kind: input, shape index: {}]   ;;  %s4180_s16 = inlined_call_operand.vmem [shape: f32[3,3], index: 16, kind: input, shape index: {}]   ;;  %s4181_s17 = inlined_call_operand.vmem [shape: f32[3,8,12], index: 17, kind: input, shape index: {}]   ;;  %s4182_s18 = inlined_call_operand.vmem [shape: f32[8,16], index: 18, kind: input, shape index: {}]   ;;  %s4183_s19 = inlined_call_operand.vmem [shape: f32[8,16], index: 19, kind: input, shape index: {}]   ;;  %s4184_s20 = inlined_call_operand.vmem [shape: f32[8,1024], index: 20, kind: output, shape index: {0}]   ;;  %s4185_s21 = inlined_call_operand.vmem [shape: f32[8,4], index: 21, kind: output, shape index: {1}]   ;;  %s4186_s22 = inlined_call_operand.vmem [shape: f32[8,4], index: 22, kind: output, shape index: {2}]  }
   0x1   :  { %4191 = sst [smem:[#allocation9_spill]] %s4164_s0 }
   0x2   :  { %4192 = sst [smem:[#allocation10_spill]] %s4165_s1 }
   0x3   :  { %4193 = sst [smem:[#allocation11_spill]] %s4166_s2 }
   0x4   :  { %4194 = sst [smem:[#allocation12_spill]] %s4167_s3 }
   0x5   :  { %4195 = sst [smem:[#allocation13_spill]] %s4168_s4 }
   0x6   :  { %4196 = sst [smem:[#allocation14_spill]] %s4169_s5 }
   0x7   :  { %4197 = sst [smem:[#allocation15_spill]] %s4170_s6 }
   0x8   :  { %28 = vsyncpa [#allocation5], 0  ;;  %s65_s29 = sshll.u32 %s4180_s16, 4  ;;  %s66_s29 = int_to_ptr.vmem [resolvable:$true] %s65_s29 }
   0x9   :  { %s3295_s30 = scalar_lea.vmem %s66_s29, 64  ;;  %p3300_p1 = scmp.lt.s32.totalorder %s66_s29, %s66_s29 }
   0xa   :  { %p3296_p0 = scmp.ne.s32.totalorder %s66_s29, %s3295_s30  ;;  %p3301_p2 = scmp.lt.s32.totalorder %s3295_s30, %s3295_s30 }
   0xc   :  { %p3302_p3 = por %p3301_p2, %p3300_p1 }
   0xe   :  { %p3303_p4 = pnand %p3302_p3, %p3296_p0 }
  0x10   :  { %3306 = shalt.err (!%p3303_p4)
}
  0x11   :  { %s3311_s4 = smov [#allocation4]  }
  0x12   :  { %68 = dma.vmem_to_smem %s66_s29, 64, %s3311_s4, [#allocation5]  }
  0x13   :  { %3307 = dma.done.wait [#allocation5], 64  }
  0x14   :  { %3308 = vsyncadd [#allocation5], 4294967232 }
  0x15   :  { %78 = sfence }
  0x16   :  { %v3444_v0 = vld [vmem:[%s4177_s13] sm:$0xff]  ;;  %v3449_v1 = vld [vmem:[%s4177_s13 + $0x8] sm:$0xff]  ;;  %v3454_v2 = vld [vmem:[%s4177_s13 + $0x10] sm:$0xff] }
  0x17   :  { %v3459_v3 = vld [vmem:[%s4177_s13 + $0x18] sm:$0xff]  ;;  %v3464_v4 = vld [vmem:[%s4177_s13 + $0x20] sm:$0xff]  ;;  %v3469_v5 = vld [vmem:[%s4177_s13 + $0x28] sm:$0xff] }
  0x18   :  { %v3474_v6 = vld [vmem:[%s4177_s13 + $0x30] sm:$0xff]  ;;  %v3479_v7 = vld [vmem:[%s4177_s13 + $0x38] sm:$0xff]  ;;  %v3484_v8 = vld [vmem:[%s4177_s13 + $0x40] sm:$0xff] }
  0x19   :  { %v3489_v9 = vld [vmem:[%s4177_s13 + $0x48] sm:$0xff]  ;;  %v3494_v10 = vld [vmem:[%s4177_s13 + $0x50] sm:$0xff]  ;;  %v3499_v11 = vld [vmem:[%s4177_s13 + $0x58] sm:$0xff] }
  0x1a   :  { %v3504_v12 = vld [vmem:[%s4177_s13 + $0x60] sm:$0xff]  ;;  %v3509_v13 = vld [vmem:[%s4177_s13 + $0x68] sm:$0xff]  ;;  %v3514_v14 = vld [vmem:[%s4177_s13 + $0x70] sm:$0xff] }
  0x1b   :  { %v3519_v15 = vld [vmem:[%s4177_s13 + $0x78] sm:$0xff] }
  0x1c   :  { %152 = vsyncadd [#allocation3], 2048  ;;  %s4198_s1 = sld [smem:[#allocation10_spill]]  ;;  %vm3313_vm0 = vmmov 0   ;;  %vm876_vm1 = vcmask 261120   ;;  %vm1058_vm2 = vcmask 1043456  }
  0x1d   :  { %s4199_s16 = sld [smem:[#allocation9_spill]]  ;;  %vm1054_vm3 = vcmask 31744   ;;  %s3314_s25 = smov 4   ;;  %vm1261_vm4 = vcmask 195584  }
  0x1e   :  { %s4200_s30 = sld [smem:[#allocation12_spill]]  ;;  %s3315_s29 = smov 124  }
  0x1f   :  { %s4201_s26 = sld [smem:[#allocation14_spill]]  ;;  %s3317_s4 = smov 112  }
  0x20   :  { %s4202_s0 = sld [smem:[#allocation11_spill]]  ;;  %s3318_s6 = smov 16  }
  0x21   :  { %s2772_s23 = sld [smem:[#allocation4 + $0x100]] }
  0x22   :  { %v3169_v16 = vld [vmem:[%s4198_s1 + $0x78] sm:$0xff]   ;;  %v3173_v20 = vld [vmem:[%s4198_s1 + $0x70] sm:$0xff]   ;;  %v3177_v24 = vld [vmem:[%s4198_s1 + $0x68] sm:$0xff]   ;;  %s4203_s27 = sld [smem:[#allocation13_spill]] }
  0x23   :  { %v3170_v17 = vld [vmem:[%s4198_s1 + $0xf8] sm:$0xff]   ;;  %2865 = vmatprep.subr.bf16.mxu0 %v3169_v16  ;;  %v3174_v21 = vld [vmem:[%s4198_s1 + $0xf0] sm:$0xff]   ;;  %v3178_v25 = vld [vmem:[%s4198_s1 + $0xe8] sm:$0xff]  }
  0x24   :  { %v3171_v18 = vld [vmem:[%s4198_s1 + $0x38] sm:$0xff]   ;;  %2887 = vmatprep.subr.bf16.mxu1 %v3170_v17  ;;  %v3175_v22 = vld [vmem:[%s4198_s1 + $0x30] sm:$0xff]   ;;  %v3179_v26 = vld [vmem:[%s4198_s1 + $0x28] sm:$0xff]  }
  0x25   :  { %v3172_v19 = vld [vmem:[%s4198_s1 + $0xb8] sm:$0xff]   ;;  %2866 = vmatpush3.bf16.msra.mxu0 %v3171_v18  ;;  %v3176_v23 = vld [vmem:[%s4198_s1 + $0xb0] sm:$0xff]   ;;  %v3180_v27 = vld [vmem:[%s4198_s1 + $0xa8] sm:$0xff]  }
  0x26   :  { %2888 = vmatpush3.bf16.msra.mxu1 %v3172_v19  ;;  %2867 = vmatprep.subr.bf16.mxu0 %v3173_v20  ;;  %v3181_v28 = vld [vmem:[%s4198_s1 + $0x60] sm:$0xff]   ;;  %v3185_v32 = vld [vmem:[%s4198_s1 + $0x58] sm:$0xff]   ;;  %v3189_v36 = vld [vmem:[%s4198_s1 + $0x50] sm:$0xff]  }
  0x27   :  { %2889 = vmatprep.subr.bf16.mxu1 %v3174_v21  ;;  %v3182_v29 = vld [vmem:[%s4198_s1 + $0xe0] sm:$0xff]   ;;  %v3186_v33 = vld [vmem:[%s4198_s1 + $0xd8] sm:$0xff]   ;;  %v3190_v37 = vld [vmem:[%s4198_s1 + $0xd0] sm:$0xff]  }
  0x28   :  { %v3183_v30 = vld [vmem:[%s4198_s1 + $0x20] sm:$0xff]   ;;  %v3187_v34 = vld [vmem:[%s4198_s1 + $0x18] sm:$0xff]   ;;  %v3191_v38 = vld [vmem:[%s4198_s1 + $0x10] sm:$0xff]  }
  0x29   :  { %2868 = vmatpush3.bf16.msra.mxu0 %v3175_v22  ;;  %v3184_v31 = vld [vmem:[%s4198_s1 + $0xa0] sm:$0xff]   ;;  %v3188_v35 = vld [vmem:[%s4198_s1 + $0x98] sm:$0xff]   ;;  %v3192_v39 = vld [vmem:[%s4198_s1 + $0x90] sm:$0xff]  }
  0x2a   :  { %2890 = vmatpush3.bf16.msra.mxu1 %v3176_v23  ;;  %2869 = vmatprep.subr.bf16.mxu0 %v3177_v24  ;;  %v3193_v40 = vld [vmem:[%s4198_s1 + $0x48] sm:$0xff]   ;;  %v3197_v44 = vld [vmem:[%s4198_s1 + $0x40] sm:$0xff]   ;;  %v3205_v54 = vld [vmem:[%s4198_s1 + $0x178] sm:$0xff]  }
  0x2b   :  { %2891 = vmatprep.subr.bf16.mxu1 %v3178_v25  ;;  %v3194_v41 = vld [vmem:[%s4198_s1 + $0xc8] sm:$0xff]   ;;  %v3198_v45 = vld [vmem:[%s4198_s1 + $0xc0] sm:$0xff]   ;;  %v3206_v55 = vld [vmem:[%s4198_s1 + $0x1f8] sm:$0xff]  }
  0x2c   :  { %v3195_v42 = vld [vmem:[%s4198_s1 + $0x8] sm:$0xff]   ;;  %v3199_v46 = vld [vmem:[%s4198_s1] sm:$0xff]   ;;  %v3207_v56 = vld [vmem:[%s4198_s1 + $0x138] sm:$0xff]  }
  0x2d   :  { %2870 = vmatpush3.bf16.msra.mxu0 %v3179_v26  ;;  %v3196_v43 = vld [vmem:[%s4198_s1 + $0x88] sm:$0xff]   ;;  %v3200_v47 = vld [vmem:[%s4198_s1 + $0x80] sm:$0xff]   ;;  %v3208_v57 = vld [vmem:[%s4198_s1 + $0x1b8] sm:$0xff]  }
  0x2e   :  { %2892 = vmatpush3.bf16.msra.mxu1 %v3180_v27  ;;  %2871 = vmatprep.subr.bf16.mxu0 %v3181_v28  ;;  %v153_v48 = vld [vmem:[%s4199_s16] sm:$0xff]  ;;  %v154_v49 = vld [vmem:[%s4199_s16 + $0x8] sm:$0xff]  ;;  %v3209_v58 = vld [vmem:[%s4198_s1 + $0x170] sm:$0xff]  }
  0x2f   :  { %2893 = vmatprep.subr.bf16.mxu1 %v3182_v29  ;;  %v2696_v50 = vcombine.low %v153_v48, %v153_v48  ;;  %v2697_v51 = vcombine.high %v153_v48, %v153_v48  ;;  %v2698_v52 = vcombine.low %v154_v49, %v154_v49  ;;  %v2699_v53 = vcombine.high %v154_v49, %v154_v49  ;;  %v3210_v59 = vld [vmem:[%s4198_s1 + $0x1f0] sm:$0xff]   ;;  %v3213_v62 = vld [vmem:[%s4198_s1 + $0x168] sm:$0xff]   ;;  %v3217_v18 = vld [vmem:[%s4198_s1 + $0x160] sm:$0xff]  }
  0x30   :  { %v3211_v60 = vld [vmem:[%s4198_s1 + $0x130] sm:$0xff]   ;;  %v3214_v63 = vld [vmem:[%s4198_s1 + $0x1e8] sm:$0xff]   ;;  %v3218_v19 = vld [vmem:[%s4198_s1 + $0x1e0] sm:$0xff]  }
  0x31   :  { %2872 = vmatpush3.bf16.msra.mxu0 %v3183_v30  ;;  %736 = vmatprep.mubr.bf16.mxu0 %v2697_v51  ;;  %v3212_v61 = vld [vmem:[%s4198_s1 + $0x1b0] sm:$0xff]   ;;  %v3215_v16 = vld [vmem:[%s4198_s1 + $0x128] sm:$0xff]   ;;  %v3219_v20 = vld [vmem:[%s4198_s1 + $0x120] sm:$0xff]  }
  0x32   :  { %2894 = vmatpush3.bf16.msra.mxu1 %v3184_v31  ;;  %2873 = vmatprep.subr.bf16.mxu0 %v3185_v32  ;;  %v3216_v17 = vld [vmem:[%s4198_s1 + $0x1a8] sm:$0xff]   ;;  %v3220_v21 = vld [vmem:[%s4198_s1 + $0x1a0] sm:$0xff]   ;;  %v3221_v22 = vld [vmem:[%s4198_s1 + $0x158] sm:$0xff]  }
  0x33   :  { %2895 = vmatprep.subr.bf16.mxu1 %v3186_v33  ;;  %776 = vmatprep.mubr.bf16.mxu1 %v2699_v53  ;;  %v3222_v23 = vld [vmem:[%s4198_s1 + $0x1d8] sm:$0xff]   ;;  %v3225_v26 = vld [vmem:[%s4198_s1 + $0x150] sm:$0xff]   ;;  %v3229_v30 = vld [vmem:[%s4198_s1 + $0x148] sm:$0xff]  }
  0x34   :  { %v3223_v24 = vld [vmem:[%s4198_s1 + $0x118] sm:$0xff]   ;;  %v3226_v27 = vld [vmem:[%s4198_s1 + $0x1d0] sm:$0xff]   ;;  %v3230_v31 = vld [vmem:[%s4198_s1 + $0x1c8] sm:$0xff]  }
  0x35   :  { %2874 = vmatpush3.bf16.msra.mxu0 %v3187_v34  ;;  %v3224_v25 = vld [vmem:[%s4198_s1 + $0x198] sm:$0xff]   ;;  %v3227_v28 = vld [vmem:[%s4198_s1 + $0x110] sm:$0xff]   ;;  %v3231_v32 = vld [vmem:[%s4198_s1 + $0x108] sm:$0xff]  }
  0x36   :  { %2896 = vmatpush3.bf16.msra.mxu1 %v3188_v35  ;;  %2875 = vmatprep.subr.bf16.mxu0 %v3189_v36  ;;  %v3228_v29 = vld [vmem:[%s4198_s1 + $0x190] sm:$0xff]   ;;  %v3232_v33 = vld [vmem:[%s4198_s1 + $0x188] sm:$0xff]   ;;  %v3233_v34 = vld [vmem:[%s4198_s1 + $0x140] sm:$0xff]  }
  0x37   :  { %2897 = vmatprep.subr.bf16.mxu1 %v3190_v37  ;;  %v3234_v35 = vld [vmem:[%s4198_s1 + $0x1c0] sm:$0xff]   ;;  %v966_v49 = vld [vmem:[%s4201_s26 + $0x78] sm:$0xff]  ;;  %v964_v51 = vld [vmem:[%s4201_s26 + $0x68] sm:$0xff] }
  0x38   :  { %v3235_v36 = vld [vmem:[%s4198_s1 + $0x100] sm:$0xff]   ;;  %v962_v53 = vld [vmem:[%s4201_s26 + $0x58] sm:$0xff] }
  0x39   :  { %2876 = vmatpush3.bf16.msra.mxu0 %v3191_v38  ;;  %v3236_v37 = vld [vmem:[%s4198_s1 + $0x180] sm:$0xff]   ;;  %v155_v38 = vld [vmem:[%s4199_s16 + $0x10] sm:$0xff]  ;;  %s2787_s1 = sld [smem:[#allocation4 + $0x81]] }
  0x3a   :  { %2898 = vmatpush3.bf16.msra.mxu1 %v3192_v39  ;;  %2877 = vmatprep.subr.bf16.mxu0 %v3193_v40  ;;  %v156_v39 = vld [vmem:[%s4199_s16 + $0x18] sm:$0xff]  ;;  %v2700_v40 = vcombine.low %v155_v38, %v155_v38  ;;  %v865_v48 = vld [vmem:[%s4200_s30] sm:$0xff]  ;;  %s2809_s16 = sld [smem:[#allocation4 + $0x1]] }
  0x3b   :  { %2899 = vmatprep.subr.bf16.mxu1 %v3194_v41  ;;  %v2701_v41 = vcombine.high %v155_v38, %v155_v38 }
  0x3d   :  { %2878 = vmatpush3.bf16.msra.mxu0 %v3195_v42  ;;  %v2702_v42 = vcombine.low %v156_v39, %v156_v39 }
  0x3e   :  { %2900 = vmatpush3.bf16.msra.mxu1 %v3196_v43  ;;  %2879 = vmatprep.subr.bf16.mxu0 %v3197_v44  ;;  %v2703_v43 = vcombine.high %v156_v39, %v156_v39  ;;  %v3312_v44 = vmov 0.0   ;;  %v2771_v39 = vld [vmem:[%s4181_s17 + $0x10] sm:$0xff] }
  0x3f   :  { %2901 = vmatprep.subr.bf16.mxu1 %v3198_v45  ;;  %v868_v45 = vld [vmem:[%s4200_s30 + $0x18] sm:$0xff] }
  0x41   :  { %2880 = vmatpush3.bf16.msra.mxu0 %v3199_v46  ;;  %v867_v46 = vld [vmem:[%s4200_s30 + $0x10] sm:$0xff] }
  0x42   :  { %2902 = vmatpush3.bf16.msra.mxu1 %v3200_v47  ;;  %2909 = vmatprep.subr.bf16.mxu0 %v3205_v54  ;;  %v866_v47 = vld [vmem:[%s4200_s30 + $0x8] sm:$0xff]  ;;  %v961_v54 = vld [vmem:[%s4201_s26 + $0x50] sm:$0xff] }
  0x43   :  { %2931 = vmatprep.subr.bf16.mxu1 %v3206_v55  ;;  %v960_v55 = vld [vmem:[%s4201_s26 + $0x48] sm:$0xff] }
  0x44   :  { %737 = vmatmul.mubr.bf16.vlgmr.msra.gmra.mxu0 %v2696_v50  ;;  %v965_v50 = vld [vmem:[%s4201_s26 + $0x70] sm:$0xff] }
  0x45   :  { %777 = vmatmul.mubr.bf16.vlgmr.msra.gmra.mxu1 %v2698_v52  ;;  %2910 = vmatpush3.bf16.msra.mxu0 %v3207_v56  ;;  %v963_v52 = vld [vmem:[%s4201_s26 + $0x60] sm:$0xff] }
  0x46   :  { %2932 = vmatpush3.bf16.msra.mxu1 %v3208_v57  ;;  %2911 = vmatprep.subr.bf16.mxu0 %v3209_v58  ;;  %v959_v56 = vld [vmem:[%s4201_s26 + $0x40] sm:$0xff]  ;;  %v958_v57 = vld [vmem:[%s4201_s26 + $0x38] sm:$0xff]  ;;  %v957_v58 = vld [vmem:[%s4201_s26 + $0x30] sm:$0xff] }
  0x47   :  { %2933 = vmatprep.subr.bf16.mxu1 %v3210_v59  ;;  %816 = vmatprep.mubr.bf16.mxu0 %v2701_v41  ;;  %v956_v59 = vld [vmem:[%s4201_s26 + $0x28] sm:$0xff] }
  0x48   :  { %856 = vmatprep.mubr.bf16.mxu1 %v2703_v43 }
  0x49   :  { %2912 = vmatpush3.bf16.msra.mxu0 %v3211_v60  ;;  %v955_v60 = vld [vmem:[%s4201_s26 + $0x20] sm:$0xff] }
  0x4a   :  { %2934 = vmatpush3.bf16.msra.mxu1 %v3212_v61  ;;  %2913 = vmatprep.subr.bf16.mxu0 %v3213_v62  ;;  %v954_v61 = vld [vmem:[%s4201_s26 + $0x18] sm:$0xff] }
  0x4b   :  { %2935 = vmatprep.subr.bf16.mxu1 %v3214_v63 }
  0x4d   :  { %2914 = vmatpush3.bf16.msra.mxu0 %v3215_v16 }
  0x4e   :  { %2936 = vmatpush3.bf16.msra.mxu1 %v3216_v17  ;;  %2915 = vmatprep.subr.bf16.mxu0 %v3217_v18 }
  0x4f   :  { %2937 = vmatprep.subr.bf16.mxu1 %v3218_v19 }
  0x51   :  { %2916 = vmatpush3.bf16.msra.mxu0 %v3219_v20 }
  0x52   :  { %2938 = vmatpush3.bf16.msra.mxu1 %v3220_v21  ;;  %2917 = vmatprep.subr.bf16.mxu0 %v3221_v22 }
  0x53   :  { %2939 = vmatprep.subr.bf16.mxu1 %v3222_v23  ;;  %v2695_v23 = vld [vmem:[%s4202_s0] ss:$0 sm:$0xff]  ;;  %s1618_s0 = sld [smem:[#allocation4]] }
  0x55   :  { %2918 = vmatpush3.bf16.msra.mxu0 %v3223_v24 }
  0x56   :  { %2940 = vmatpush3.bf16.msra.mxu1 %v3224_v25  ;;  %2919 = vmatprep.subr.bf16.mxu0 %v3225_v26 }
  0x57   :  { %2941 = vmatprep.subr.bf16.mxu1 %v3226_v27 }
  0x59   :  { %2920 = vmatpush3.bf16.msra.mxu0 %v3227_v28 }
  0x5a   :  { %2942 = vmatpush3.bf16.msra.mxu1 %v3228_v29  ;;  %2921 = vmatprep.subr.bf16.mxu0 %v3229_v30 }
  0x5b   :  { %2943 = vmatprep.subr.bf16.mxu1 %v3230_v31 }
  0x5d   :  { %2922 = vmatpush3.bf16.msra.mxu0 %v3231_v32 }
  0x5e   :  { %2944 = vmatpush3.bf16.msra.mxu1 %v3232_v33  ;;  %2923 = vmatprep.subr.bf16.mxu0 %v3233_v34 }
  0x5f   :  { %2945 = vmatprep.subr.bf16.mxu1 %v3234_v35 }
  0x61   :  { %2924 = vmatpush3.bf16.msra.mxu0 %v3235_v36 }
  0x62   :  { %2946 = vmatpush3.bf16.msra.mxu1 %v3236_v37  ;;  %3015 = vmatprep.subr.mxu0 %v3312_v44 }
  0x63   :  { %3026 = vmatprep.subr.mxu1 %v3312_v44 }
  0x64   :  { %817 = vmatmul.mubr.bf16.vlgmr.msra.gmra.mxu0 %v2700_v40  ;;  %v1048_v40 = vstv %s2772_s23  ;;  %s3316_s23 = smov 120  }
  0x65   :  { %857 = vmatmul.mubr.bf16.vlgmr.msra.gmra.mxu1 %v2702_v42  ;;  %3016 = vmatpush3.msra.mxu0 %v868_v45  ;;  %v2774_v42 = vld [vmem:[%s4171_s7 + $0x18] sm:$0xf]  ;;  %v1049_v43 = vmul.f32 %v2771_v39, %v1048_v40  ;;  %v953_v45 = vld [vmem:[%s4201_s26 + $0x10] sm:$0xff]  ;;  %v2790_v39 = vld [vmem:[%s4179_s15 + $0x20] sm:$0xff] }
  0x66   :  { %3017 = vmatprep.subr.mxu0 %v3312_v44  ;;  %3023 = vmatprep.mubr.msk.f32.mxu0 %vm3313_vm0, %v3312_v44  ;;  %v2791_v40 = vld [vmem:[%s4179_s15 + $0x28] sm:$0xff] }
  0x67   :  { %3018 = vmatpush3.msra.mxu0 %v867_v46  ;;  %3058 = vmatprep.mubr.msk.f32.mxu1 %vm3313_vm0, %v3312_v44  ;;  %v952_v46 = vld [vmem:[%s4201_s26 + $0x8] sm:$0xff] }
  0x68   :  { %3019 = vmatprep.subr.mxu0 %v3312_v44  ;;  %3027 = vmatpush3.msra.mxu1 %v966_v49  ;;  %v2780_v49 = vld [vmem:[%s4173_s9 + $0x50] sm:$0xff] }
  0x69   :  { %3020 = vmatpush3.msra.mxu0 %v866_v47  ;;  %3028 = vmatprep.subr.mxu1 %v3312_v44  ;;  %v2781_v47 = vld [vmem:[%s4173_s9 + $0x58] sm:$0xff] }
  0x6a   :  { %3021 = vmatprep.subr.mxu0 %v3312_v44  ;;  %3029 = vmatpush3.msra.mxu1 %v965_v50  ;;  %v2779_v50 = vld [vmem:[%s4173_s9 + $0x48] sm:$0xff] }
  0x6b   :  { %3022 = vmatpush3.msra.mxu0 %v865_v48  ;;  %3030 = vmatprep.subr.mxu1 %v3312_v44  ;;  %v951_v48 = vld [vmem:[%s4201_s26] sm:$0xff]  ;;  %s2786_s26 = sld [smem:[#allocation4 + $0x80]] }
  0x6c   :  { %3061 = vmatprep.subr.mxu0 %v3312_v44  ;;  %3031 = vmatpush3.msra.mxu1 %v964_v51  ;;  %v2778_v51 = vld [vmem:[%s4173_s9 + $0x40] sm:$0xff] }
  0x6d   :  { %3032 = vmatprep.subr.mxu1 %v3312_v44 }
  0x6e   :  { %3033 = vmatpush3.msra.mxu1 %v963_v52  ;;  %v2785_v52 = vld [vmem:[%s4181_s17 + $0x8] sm:$0xff] }
  0x6f   :  { %3034 = vmatprep.subr.mxu1 %v3312_v44  ;;  %1235 = vrot.lane.b32.xlu0 %v2785_v52, %s3314_s25 }
  0x70   :  { %3035 = vmatpush3.msra.mxu1 %v962_v53  ;;  %v2768_v53 = vld [vmem:[%s4203_s27] ss:$0 sm:$0xff]  ;;  %s3319_s27 = smov 116  }
  0x71   :  { %3036 = vmatprep.subr.mxu1 %v3312_v44 }
  0x72   :  { %3037 = vmatpush3.msra.mxu1 %v961_v54 }
  0x73   :  { %3038 = vmatprep.subr.mxu1 %v3312_v44 }
  0x74   :  { %3039 = vmatpush3.msra.mxu1 %v960_v55 }
  0x75   :  { %3040 = vmatprep.subr.mxu1 %v3312_v44 }
  0x76   :  { %3041 = vmatpush3.msra.mxu1 %v959_v56 }
  0x77   :  { %3042 = vmatprep.subr.mxu1 %v3312_v44 }
  0x78   :  { %3043 = vmatpush3.msra.mxu1 %v958_v57  ;;  %v2777_v57 = vld [vmem:[%s4172_s8 + $0x2] ss:$0 sm:$0xff] }
  0x79   :  { %3044 = vmatprep.subr.mxu1 %v3312_v44 }
  0x7a   :  { %3045 = vmatpush3.msra.mxu1 %v957_v58 }
  0x7b   :  { %3046 = vmatprep.subr.mxu1 %v3312_v44 }
  0x7c   :  { %3047 = vmatpush3.msra.mxu1 %v956_v59 }
  0x7d   :  { %3048 = vmatprep.subr.mxu1 %v3312_v44 }
  0x7e   :  { %3049 = vmatpush3.msra.mxu1 %v955_v60 }
  0x7f   :  { %3050 = vmatprep.subr.mxu1 %v3312_v44 }
  0x80   :  { %3051 = vmatpush3.msra.mxu1 %v954_v61 }
  0x81   :  { %3052 = vmatprep.subr.mxu1 %v3312_v44 }
  0x82   :  { %3053 = vmatpush3.msra.mxu1 %v953_v45 }
  0x83   :  { %3054 = vmatprep.subr.mxu1 %v3312_v44 }
  0x84   :  { %3055 = vmatpush3.msra.mxu1 %v952_v46 }
  0x85   :  { %3056 = vmatprep.subr.mxu1 %v3312_v44 }
  0x86   :  { %3057 = vmatpush3.msra.mxu1 %v951_v48 }
  0x87   :  { %3095 = vmatprep.subr.mxu1 %v3312_v44 }
 0x104   :  { %v2881_v62 = vpop.f32.mrf.mxu0 }
 0x105   :  { %v2903_v63 = vpop.f32.mrf.mxu1 }
 0x106   :  { %v2882_v16 = vpop.f32.mrf.mxu0 }
 0x107   :  { %v2904_v17 = vpop.f32.mrf.mxu1  ;;  %v2883_v22 = vadd.f32 %v2882_v16, %v2881_v62 }
 0x108   :  { %v2884_v18 = vpop.f32.mrf.mxu0  ;;  %v2905_v25 = vadd.f32 %v2904_v17, %v2903_v63  ;;  %v1249_v63 = vstv %s2787_s1  ;;  %v1607_v17 = vld [vmem:[%s4181_s17] sm:$0xff]  ;;  %s2810_s17 = sld [smem:[#allocation4 + $0x2]] }
 0x109   :  { %v2906_v19 = vpop.f32.mrf.mxu1  ;;  %v739_v24 = vadd.f32 %v2883_v22, %v2695_v23  ;;  %v1250_v16 = vmul.f32 %v2785_v52, %v1249_v63  ;;  %s4204_s1 = sld [smem:[#allocation15_spill]] }
 0x10a   :  { %v2885_v20 = vpop.f32.mrf.mxu0 }
 0x10b   :  { %v2907_v21 = vpop.f32.mrf.mxu1  ;;  %v779_v29 = vadd.f32 %v2905_v25, %v739_v24  ;;  %1254 = vrot.lane.b32.xlu1 %v1250_v16, %s3315_s29  ;;  %v2783_v20 = vld [vmem:[%s4174_s10 + $0x2] ss:$0 sm:$0xff] }
 0x10f   :  { %1609 = vrot.lane.b32.xlu1 %v1607_v17, %s3314_s25 }
 0x124   :  { %v2925_v26 = vpop.f32.mrf.mxu0 }
 0x125   :  { %v2947_v27 = vpop.f32.mrf.mxu1 }
 0x126   :  { %v2926_v28 = vpop.f32.mrf.mxu0 }
 0x127   :  { %v2927_v30 = vadd.f32 %v2926_v28, %v2925_v26  ;;  %v2948_v31 = vpop.f32.mrf.mxu1 }
 0x128   :  { %v2928_v32 = vpop.f32.mrf.mxu0  ;;  %v2949_v34 = vadd.f32 %v2948_v31, %v2947_v27  ;;  %v1236_v27 = vpop.permute.xlu0 %1235  ;;  %v1632_v31 = vstv %s2810_s17 }
 0x129   :  { %v819_v33 = vadd.f32 %v2927_v30, %v779_v29  ;;  %v2950_v35 = vpop.f32.mrf.mxu1  ;;  %v1633_v32 = vmul.f32 %v1632_v31, %v1607_v17 }
 0x12a   :  { %v2929_v36 = vpop.f32.mrf.mxu0 }
 0x12b   :  { %v859_v37 = vadd.f32 %v2949_v34, %v819_v33  ;;  %v2951_v38 = vpop.f32.mrf.mxu1  ;;  %v1245_v33 = vstv %s2786_s26 }
 0x12c   :  { %v2795_v38 = vld [vmem:[%s4171_s7 + $0xc] sm:$0xf] }
 0x12d   :  { %v864_v41 = vmax.f32 %v859_v37, 0.0  ;;  %v2789_v37 = vld [vmem:[%s4179_s15 + $0x18] sm:$0xff] }
 0x12f   :  { %3024 = vmatmul.mubr.msk.f32.vlgmr.msra.gmra.mxu0 %vm876_vm1, %v864_v41  ;;  %v2799_v41 = vld [vmem:[%s4171_s7 + $0x10] sm:$0xf] }
 0x130   :  { %3062 = vmatpush3.msk.msra.mxu0 %vm1058_vm2, %v2774_v42  ;;  %3063 = vmatprep.mubr.msk.f32.mxu0 %vm3313_vm0, %v3312_v44 }
 0x131   :  { %3066 = vmatprep.subr.mxu0 %v3312_v44 }
 0x133   :  { %3064 = vmatmul.mubr.msk.f32.vlgmr.msra.gmra.mxu0 %vm1054_vm3, %v1049_v43 }
 0x134   :  { %3074 = vmatprep.mubr.msk.f32.mxu0 %vm3313_vm0, %v3312_v44  ;;  %3067 = vmatpush3.msra.mxu0 %v2781_v47  ;;  %v1628_v47 = vstv %s2809_s16 }
 0x135   :  { %3068 = vmatprep.subr.mxu0 %v3312_v44 }
 0x136   :  { %3069 = vmatpush3.msra.mxu0 %v2780_v49 }
 0x137   :  { %3070 = vmatprep.subr.mxu0 %v3312_v44 }
 0x138   :  { %3071 = vmatpush3.msra.mxu0 %v2779_v50 }
 0x139   :  { %3072 = vmatprep.subr.mxu0 %v3312_v44 }
 0x13a   :  { %3073 = vmatpush3.msra.mxu0 %v2778_v51 }
 0x13b   :  { %3077 = vmatprep.subr.mxu0 %v3312_v44 }
 0x17d   :  { %v1255_v26 = vpop.permute.xlu1 %1254 }
 0x1ef   :  { %v946_v54 = vpop.f32.mrf.mxu0 }
 0x1f0   :  { %v947_v55 = vadd.f32 %v2768_v53, %v946_v54  ;;  %v2805_v54 = vld [vmem:[%s4173_s9 + $0x38] sm:$0xff] }
 0x1f1   :  { %v3025_v56 = vpop.f32.mrf.mxu0 }
 0x1f2   :  { %v950_v58 = vmax.f32 %v947_v55, 0.0  ;;  %v2804_v55 = vld [vmem:[%s4173_s9 + $0x30] sm:$0xff]  ;;  %v2803_v56 = vld [vmem:[%s4173_s9 + $0x28] sm:$0xff] }
 0x1f3   :  { %v1128_v59 = vpop.f32.mrf.mxu0 }
 0x1f4   :  { %v1138_v60 = vadd.f32 %v2777_v57, %v1128_v59  ;;  %3059 = vmatmul.mubr.f32.vlgmr.msra.gmra.mxu1 %v950_v58  ;;  %v2802_v57 = vld [vmem:[%s4173_s9 + $0x20] sm:$0xff] }
 0x1f5   :  { %v3065_v61 = vpop.f32.mrf.mxu0  ;;  %3097 = vmatprep.mubr.msk.f32.mxu1 %vm3313_vm0, %v3312_v44  ;;  %3096 = vmatpush3.msk.msra.mxu1 %vm1058_vm2, %v2799_v41  ;;  %v2798_v58 = vld [vmem:[%s4172_s8 + $0x1] ss:$0 sm:$0xff] }
 0x1f6   :  { %v1139_v62 = vmax.f32 %v1138_v60, 0.0  ;;  %3111 = vmatprep.subr.mxu1 %v3312_v44 }
 0x1f8   :  { %3075 = vmatmul.mubr.msk.f32.vlgmr.msra.gmra.mxu0 %vm876_vm1, %v1139_v62 }
 0x1f9   :  { %3081 = vmatprep.mubr.msk.f32.mxu0 %vm3313_vm0, %v3312_v44  ;;  %3078 = vmatpush3.msra.mxu0 %v1255_v26 }
 0x1fa   :  { %3079 = vmatprep.subr.mxu0 %v3312_v44 }
 0x2b4   :  { %v3864_v18 = vpop.f32.mrf.mxu1 }
 0x2b6   :  { %v3060_v19 = vpop.f32.mrf.mxu1 }
 0x2b7   :  { %v2770_v19 = vld [vmem:[%s4204_s1] ss:$0 sm:$0xff] }
 0x2b8   :  { %v1222_v21 = vpop.f32.mrf.mxu0 }
 0x2b9   :  { %v3869_v22 = vadd.f32 %v2783_v20, %v1222_v21  ;;  %v2807_v20 = vld [vmem:[%s4174_s10 + $0x1] ss:$0 sm:$0xff] }
 0x2ba   :  { %v3076_v23 = vpop.f32.mrf.mxu0 }
 0x2bb   :  { %v1226_v24 = vmul.f32 0.5, %v3869_v22  ;;  %v1041_v23 = vadd.f32 %v2770_v19, %v3864_v18  ;;  %v1974_v19 = vld [vmem:[%s4173_s9] sm:$0xff] }
 0x2bd   :  { %v1227_v25 = vmul.f32 1.442695, %v1226_v24 }
 0x2bf   :  { %3241 = vpow2.f32 %v1227_v25 }
 0x2cc   :  { %v3873_v28 = vpop.eup %3241 }
 0x2cd   :  { %v1238_v29 = vmul.f32 %v3873_v28, %v1236_v27  ;;  %v1621_v30 = vmul.f32 %v3873_v28, %v1607_v17  ;;  %v2066_v27 = vsub.f32 0.0, %v1041_v23 }
 0x2cf   :  { %1240 = vrot.lane.b32.xlu0 %v1238_v29, %s3315_s29 }
 0x2d3   :  { %1623 = vrot.lane.b32.xlu0 %v1621_v30, %s3315_s29  ;;  %v2067_v30 = vmul.f32 1.442695, %v2066_v27 }
 0x2d7   :  { %1636 = vrot.lane.b32.xlu0 %v1633_v32, %s3316_s23  ;;  %v1229_v32 = vsub.f32 0.0, %v3869_v22 }
 0x341   :  { %v1241_v34 = vpop.permute.xlu0 %1240 }
 0x342   :  { %v1243_v35 = vadd.f32 %v1241_v34, %v3869_v22  ;;  %v1230_v34 = vmul.f32 1.442695, %v1229_v32 }
 0x344   :  { %v1246_v36 = vmul.f32 %v1245_v33, %v1243_v35  ;;  %v1610_v35 = vpop.permute.xlu1 %1609 }
 0x345   :  { %v1624_v42 = vpop.permute.xlu0 %1623 }
 0x346   :  { %3080 = vmatpush3.msra.mxu0 %v1246_v36  ;;  %v1626_v45 = vadd.f32 %v1624_v42, %v3869_v22 }
 0x347   :  { %3082 = vmatmul.mubr.msk.f32.vlgmr.msra.gmra.mxu0 %vm1261_vm4, %v2789_v37  ;;  %3090 = vmatprep.subr.mxu0 %v3312_v44 }
 0x348   :  { %3084 = vmatprep.mubr.msk.f32.mxu0 %vm3313_vm0, %v3312_v44  ;;  %3091 = vmatpush3.msk.msra.mxu0 %vm1058_vm2, %v2795_v38  ;;  %v1629_v50 = vmul.f32 %v1628_v47, %v1626_v45  ;;  %v1639_v45 = vld [vmem:[%s4179_s15] sm:$0xff] }
 0x349   :  { %3100 = vmatprep.subr.mxu0 %v3312_v44  ;;  %v1637_v48 = vpop.permute.xlu0 %1636 }
 0x34b   :  { %3085 = vmatmul.mubr.msk.f32.gmra.mxu0 %vm1261_vm4, %v2790_v39 }
 0x34c   :  { %3087 = vmatprep.mubr.msk.f32.mxu0 %vm3313_vm0, %v3312_v44 }
 0x34f   :  { %3088 = vmatmul.mubr.msk.f32.gmra.mxu0 %vm1261_vm4, %v2791_v40  ;;  %v1619_v40 = vstv %s1618_s0 }
 0x350   :  { %3092 = vmatprep.mubr.msk.f32.mxu0 %vm3313_vm0, %v3312_v44 }
 0x407   :  { %v1337_v43 = vpop.f32.mrf.mxu0 }
 0x408   :  { %3093 = vmatmul.mubr.msk.f32.vlgmr.msra.gmra.mxu0 %vm1054_vm3, %v1337_v43 }
 0x409   :  { %v3083_v46 = vpop.f32.mrf.mxu0  ;;  %3108 = vmatprep.mubr.msk.f32.mxu0 %vm3313_vm0, %v3312_v44  ;;  %3101 = vmatpush3.msra.mxu0 %v2805_v54 }
 0x40a   :  { %3102 = vmatprep.subr.mxu0 %v3312_v44 }
 0x40b   :  { %v1342_v49 = vpop.f32.mrf.mxu0  ;;  %3103 = vmatpush3.msra.mxu0 %v2804_v55 }
 0x40c   :  { %3098 = vmatmul.mubr.msk.f32.vlgmr.msra.gmra.mxu1 %vm1054_vm3, %v1342_v49  ;;  %3104 = vmatprep.subr.mxu0 %v3312_v44  ;;  %v1640_v49 = vld [vmem:[%s4179_s15 + $0x8] sm:$0xff] }
 0x40d   :  { %3112 = vmatpush3.msra.mxu1 %v1637_v48  ;;  %v3086_v51 = vpop.f32.mrf.mxu0  ;;  %3117 = vmatprep.mubr.msk.f32.mxu1 %vm3313_vm0, %v3312_v44  ;;  %v2820_v48 = vld [vmem:[%s4171_s7 + $0x8] sm:$0xf] }
 0x40e   :  { %3113 = vmatprep.subr.mxu1 %v3312_v44  ;;  %3105 = vmatpush3.msra.mxu0 %v2803_v56  ;;  %v1731_v51 = vld [vmem:[%s4171_s7] sm:$0xf]  ;;  %v2817_v56 = vld [vmem:[%s4171_s7 + $0x4] sm:$0xf] }
 0x40f   :  { %3114 = vmatpush3.msra.mxu1 %v1629_v50  ;;  %v1347_v52 = vpop.f32.mrf.mxu0  ;;  %3106 = vmatprep.subr.mxu0 %v3312_v44  ;;  %v1641_v50 = vld [vmem:[%s4179_s15 + $0x10] sm:$0xff] }
 0x410   :  { %3115 = vmatprep.subr.mxu1 %v3312_v44  ;;  %3107 = vmatpush3.msra.mxu0 %v2802_v57 }
 0x411   :  { %v3089_v53 = vpop.f32.mrf.mxu0  ;;  %3126 = vmatprep.subr.mxu0 %v3312_v44 }
 0x4c8   :  { %v1424_v59 = vpop.f32.mrf.mxu0 }
 0x4c9   :  { %v1434_v61 = vadd.f32 %v2798_v58, %v1424_v59 }
 0x4ca   :  { %v3094_v60 = vpop.f32.mrf.mxu0 }
 0x4cc   :  { %v1509_v62 = vpop.f32.mrf.mxu1 }
 0x4cd   :  { %v1513_v63 = vadd.f32 %v1509_v62, %v1434_v61 }
 0x4ce   :  { %v3099_v16 = vpop.f32.mrf.mxu1 }
 0x4cf   :  { %v1514_v17 = vmax.f32 %v1513_v63, 0.0  ;;  %v1977_v63 = vld [vmem:[%s4173_s9 + $0x18] sm:$0xff]  ;;  %v1976_v16 = vld [vmem:[%s4173_s9 + $0x10] sm:$0xff] }
 0x4d1   :  { %3109 = vmatmul.mubr.msk.f32.vlgmr.msra.gmra.mxu0 %vm876_vm1, %v1514_v17  ;;  %v1975_v17 = vld [vmem:[%s4173_s9 + $0x8] sm:$0xff] }
 0x4d2   :  { %3128 = vmatprep.mubr.msk.f32.mxu0 %vm3313_vm0, %v3312_v44  ;;  %3127 = vmatpush3.msk.msra.mxu0 %vm1058_vm2, %v1731_v51 }
 0x4d3   :  { %3131 = vmatprep.subr.mxu0 %v3312_v44 }
 0x591   :  { %v1597_v21 = vpop.f32.mrf.mxu0 }
 0x592   :  { %v3948_v24 = vadd.f32 %v2807_v20, %v1597_v21  ;;  %v2816_v21 = vld [vmem:[%s4172_s8] ss:$0 sm:$0xff] }
 0x593   :  { %v3110_v25 = vpop.f32.mrf.mxu0 }
 0x594   :  { %v1601_v26 = vmul.f32 0.5, %v3948_v24  ;;  %v1604_v31 = vsub.f32 0.0, %v3948_v24 }
 0x596   :  { %v1602_v29 = vmul.f32 1.442695, %v1601_v26  ;;  %v1605_v33 = vmul.f32 1.442695, %v1604_v31 }
 0x598   :  { %3243 = vpow2.f32 %v1602_v29 }
 0x599   :  { %3245 = vpow2.f32 %v2067_v30 }
 0x59a   :  { %3247 = vpow2.f32 %v1605_v33 }
 0x59b   :  { %3249 = vpow2.f32 %v1230_v34 }
 0x5a5   :  { %v3953_v36 = vpop.eup %3243 }
 0x5a6   :  { %v1612_v18 = vmul.f32 %v3953_v36, %v1610_v35  ;;  %v3957_v37 = vpop.eup %3245 }
 0x5a7   :  { %v3960_v38 = vpop.eup %3247 }
 0x5a8   :  { %1614 = vrot.lane.b32.xlu1 %v1612_v18, %s3315_s29  ;;  %v3964_v39 = vpop.eup %3249 }
 0x5ac   :  { %2081 = vrot.lane.b32.xlu1 %v3957_v37, %s3317_s4 }
 0x5b0   :  { %2111 = vrot.lane.b32.xlu1 %v3960_v38, %s3315_s29 }
 0x5b4   :  { %2142 = vrot.lane.b32.xlu1 %v3964_v39, %s3315_s29 }
 0x61a   :  { %v1615_v41 = vpop.permute.xlu1 %1614 }
 0x61b   :  { %v1617_v42 = vadd.f32 %v1615_v41, %v3948_v24 }
 0x61d   :  { %v1620_v43 = vmul.f32 %v1619_v40, %v1617_v42 }
 0x61e   :  { %v3972_v46 = vpop.permute.xlu1 %2081 }
 0x61f   :  { %v3975_v47 = vmul.f32 %v3972_v46, %v1041_v23  ;;  %3116 = vmatpush3.msra.mxu1 %v1620_v43  ;;  %v2065_v43 = vld [vmem:[%s4183_s19] sm:$0xff] }
 0x620   :  { %3118 = vmatmul.mubr.msk.f32.vlgmr.msra.gmra.mxu1 %vm1261_vm4, %v1639_v45  ;;  %3136 = vmatprep.subr.mxu1 %v3312_v44  ;;  %v2171_v45 = vadd.f32 1.0, %v3957_v37 }
 0x621   :  { %2176 = vrot.lane.b32.xlu1 %v3975_v47, %s3318_s6  ;;  %2116 = vrot.lane.b32.xlu0 %v3975_v47, %s3315_s29 }
 0x622   :  { %3120 = vmatprep.mubr.msk.f32.mxu1 %vm3313_vm0, %v3312_v44  ;;  %3137 = vmatpush3.msk.msra.mxu1 %vm1058_vm2, %v2820_v48  ;;  %v2112_v52 = vpop.permute.xlu1 %2111 }
 0x623   :  { %3152 = vmatprep.subr.mxu1 %v3312_v44  ;;  %v2114_v53 = vmul.f32 %v2112_v52, %v3948_v24 }
 0x624   :  { %3121 = vmatmul.mubr.msk.f32.gmra.mxu1 %vm1261_vm4, %v1640_v49 }
 0x625   :  { %2070 = vrot.lane.b32.xlu1 %v3957_v37, %s3319_s27  ;;  %3123 = vmatprep.mubr.msk.f32.mxu1 %vm3313_vm0, %v3312_v44 }
 0x626   :  { %v2143_v48 = vpop.permute.xlu1 %2142 }
 0x627   :  { %v2145_v51 = vmul.f32 %v2143_v48, %v3869_v22 }
 0x628   :  { %3124 = vmatmul.mubr.msk.f32.gmra.mxu1 %vm1261_vm4, %v1641_v50 }
 0x629   :  { %3138 = vmatprep.mubr.msk.f32.mxu1 %vm3313_vm0, %v3312_v44 }
 0x693   :  { %v2117_v54 = vpop.permute.xlu0 %2116 }
 0x694   :  { %v2119_v55 = vadd.f32 %v2117_v54, %v2114_v53 }
 0x696   :  { %2121 = vrot.lane.b32.xlu1 %v2119_v55, %s3314_s25  ;;  %v2177_v55 = vpop.permute.xlu1 %2176 }
 0x6e0   :  { %v1717_v57 = vpop.f32.mrf.mxu1 }
 0x6e1   :  { %3129 = vmatmul.mubr.msk.f32.vlgmr.msra.gmra.mxu0 %vm1054_vm3, %v1717_v57 }
 0x6e2   :  { %v3119_v58 = vpop.f32.mrf.mxu1  ;;  %3132 = vmatpush3.msk.msra.mxu0 %vm1058_vm2, %v2817_v56  ;;  %3133 = vmatprep.mubr.msk.f32.mxu0 %vm3313_vm0, %v3312_v44 }
 0x6e3   :  { %3141 = vmatprep.subr.mxu0 %v3312_v44 }
 0x6e4   :  { %v1722_v59 = vpop.f32.mrf.mxu1 }
 0x6e5   :  { %3134 = vmatmul.mubr.msk.f32.vlgmr.msra.gmra.mxu0 %vm1054_vm3, %v1722_v59 }
 0x6e6   :  { %v3122_v60 = vpop.f32.mrf.mxu1  ;;  %3149 = vmatprep.mubr.msk.f32.mxu0 %vm3313_vm0, %v3312_v44  ;;  %3142 = vmatpush3.msra.mxu0 %v1977_v63 }
 0x6e7   :  { %3143 = vmatprep.subr.mxu0 %v3312_v44  ;;  %v2202_v60 = vld [vmem:[%s4175_s11] sm:$0xf] }
 0x6e8   :  { %v1727_v61 = vpop.f32.mrf.mxu1  ;;  %3144 = vmatpush3.msra.mxu0 %v1976_v16 }
 0x6e9   :  { %3139 = vmatmul.mubr.msk.f32.vlgmr.msra.gmra.mxu1 %vm1054_vm3, %v1727_v61  ;;  %3145 = vmatprep.subr.mxu0 %v3312_v44  ;;  %v2107_v61 = vadd.f32 %v3960_v38, %v3972_v46 }
 0x6ea   :  { %v3125_v62 = vpop.f32.mrf.mxu1  ;;  %3154 = vmatprep.mubr.msk.f32.mxu1 %vm3313_vm0, %v3312_v44  ;;  %3146 = vmatpush3.msra.mxu0 %v1975_v17 }
 0x6eb   :  { %3147 = vmatprep.subr.mxu0 %v3312_v44  ;;  %v2823_v44 = vld [vmem:[%s4174_s10] ss:$0 sm:$0xff]  ;;  %s3320_s10 = smov 108   ;;  %3153 = vmatpush3.msk.msra.mxu1 %vm1058_vm2, %v2202_v60  ;;  %v2071_v62 = vpop.permute.xlu1 %2070 }
 0x6ec   :  { %3148 = vmatpush3.msra.mxu0 %v1974_v19 }
 0x7a1   :  { %v1804_v20 = vpop.f32.mrf.mxu0 }
 0x7a2   :  { %v1814_v26 = vadd.f32 %v2816_v21, %v1804_v20  ;;  %v2122_v21 = vpop.permute.xlu1 %2121 }
 0x7a3   :  { %v3130_v23 = vpop.f32.mrf.mxu0 }
 0x7a5   :  { %v1889_v25 = vpop.f32.mrf.mxu0 }
 0x7a6   :  { %v1893_v29 = vadd.f32 %v1889_v25, %v1814_v26 }
 0x7a7   :  { %v3135_v27 = vpop.f32.mrf.mxu0 }
 0x7a9   :  { %v1968_v30 = vpop.f32.mrf.mxu1 }
 0x7aa   :  { %v1972_v31 = vadd.f32 %v1968_v30, %v1893_v29 }
 0x7ab   :  { %v3140_v32 = vpop.f32.mrf.mxu1 }
 0x7ac   :  { %v1973_v33 = vmax.f32 %v1972_v31, 0.0 }
 0x7ae   :  { %3150 = vmatmul.mubr.msk.f32.vlgmr.msra.gmra.mxu0 %vm876_vm1, %v1973_v33 }
 0x86e   :  { %v2054_v34 = vpop.f32.mrf.mxu0 }
 0x86f   :  { %v4047_v35 = vadd.f32 %v2823_v44, %v2054_v34 }
 0x870   :  { %v3151_v18 = vpop.f32.mrf.mxu0 }
 0x871   :  { %v2061_v40 = vsub.f32 0.0, %v4047_v35  ;;  %v2058_v19 = vmul.f32 0.5, %v4047_v35 }
 0x873   :  { %v2062_v41 = vmul.f32 1.442695, %v2061_v40  ;;  %v2059_v20 = vmul.f32 1.442695, %v2058_v19  ;;  %v2838_v19 = vcombine.low %v3489_v9, %v3509_v13 }
 0x875   :  { %3251 = vpow2.f32 %v2062_v41 }
 0x876   :  { %3253 = vrcp.f32 %v2171_v45 }
 0x877   :  { %3255 = vrcp.f32 %v2107_v61 }
 0x882   :  { %v3252_v42 = vpop.eup %3251 }
 0x883   :  { %2077 = vrot.lane.b32.xlu0 %v3252_v42, %s3315_s29  ;;  %v3254_v56 = vpop.eup %3253  ;;  %v2073_v63 = vadd.f32 %v3252_v42, %v2071_v62 }
 0x884   :  { %v2179_v58 = vmul.f32 %v3254_v56, %v2177_v55  ;;  %v3256_v23 = vpop.eup %3255 }
 0x885   :  { %3257 = vrcp.f32 %v2073_v63  ;;  %v2124_v26 = vmul.f32 %v3256_v23, %v2122_v21  ;;  %v2132_v30 = vmul.f32 %v3256_v23, %v2065_v43 }
 0x887   :  { %2146 = vrot.lane.b32.xlu0 %v3975_v47, %s3316_s23  ;;  %v2133_v32 = vadd.f32 %v2132_v30, %v2124_v26 }
 0x88b   :  { %2186 = vrot.lane.b32.xlu0 %v2065_v43, %s3318_s6  ;;  %s3321_s6 = smov 104  }
 0x88f   :  { %2135 = vrot.lane.b32.xlu0 %v3957_v37, %s3320_s10 }
 0x892   :  { %v3258_v27 = vpop.eup %3257 }
 0x893   :  { %2102 = vrot.lane.b32.xlu0 %v2065_v43, %s3314_s25 }
 0x8f5   :  { %v2078_v49 = vpop.permute.xlu0 %2077 }
 0x8f6   :  { %v2080_v50 = vmul.f32 %v2078_v49, %v4047_v35 }
 0x8f8   :  { %v2085_v52 = vadd.f32 %v3975_v47, %v2080_v50  ;;  %v2064_v47 = vld [vmem:[%s4182_s18] sm:$0xff] }
 0x8f9   :  { %v2147_v53 = vpop.permute.xlu0 %2146 }
 0x8fa   :  { %v2149_v54 = vadd.f32 %v2147_v53, %v2145_v51  ;;  %2087 = vrot.lane.b32.xlu1 %v2085_v52, %s3314_s25 }
 0x8fc   :  { %2151 = vrot.lane.b32.xlu0 %v2149_v54, %s3314_s25 }
 0x8fd   :  { %v2187_v57 = vpop.permute.xlu0 %2186 }
 0x8fe   :  { %v2189_v37 = vmul.f32 %v3254_v56, %v2187_v57  ;;  %2165 = vrot.lane.b32.xlu1 %v2065_v43, %s3315_s29  ;;  %v2125_v43 = vmul.f32 %v3953_v36, %v2064_v47 }
 0x900   :  { %v2190_v59 = vadd.f32 %v2189_v37, %v2179_v58 }
 0x901   :  { %v2136_v16 = vpop.permute.xlu0 %2135 }
 0x902   :  { %2192 = vrot.lane.b32.xlu0 %v2190_v59, %s3321_s6  ;;  %v2138_v17 = vadd.f32 %v3964_v39, %v2136_v16  ;;  %v2837_v16 = vcombine.high %v3484_v8, %v3504_v12 }
 0x904   :  { %3259 = vrcp.f32 %v2138_v17  ;;  %v2836_v17 = vcombine.low %v3484_v8, %v3504_v12 }
 0x905   :  { %v2103_v25 = vpop.permute.xlu0 %2102  ;;  %3261 = vpow2.f32 %v2059_v20 }
 0x906   :  { %2092 = vrot.lane.b32.xlu0 %v2064_v47, %s3314_s25  ;;  %v2105_v38 = vmul.f32 %v3258_v27, %v2103_v25 }
 0x911   :  { %v3260_v44 = vpop.eup %3259 }
 0x912   :  { %v3262_v49 = vpop.eup %3261 }
 0x96c   :  { %v2088_v29 = vpop.permute.xlu1 %2087 }
 0x96d   :  { %v2090_v46 = vmul.f32 %v3258_v27, %v2088_v29 }
 0x96e   :  { %v2152_v31 = vpop.permute.xlu0 %2151 }
 0x96f   :  { %v2106_v33 = vadd.f32 %v2105_v38, %v2090_v46  ;;  %v2154_v34 = vmul.f32 %v3260_v44, %v2152_v31 }
 0x970   :  { %v2166_v39 = vpop.permute.xlu1 %2165 }
 0x971   :  { %v2168_v18 = vmul.f32 %v3260_v44, %v2166_v39  ;;  %v2134_v40 = vmul.f32 %v2133_v32, %v2106_v33 }
 0x973   :  { %v2169_v41 = vadd.f32 %v2168_v18, %v2154_v34 }
 0x974   :  { %v2193_v42 = vpop.permute.xlu0 %2192 }
 0x975   :  { %v2170_v45 = vmul.f32 %v2169_v41, %v2134_v40 }
 0x977   :  { %v2195_v48 = vmul.f32 %v2193_v42, %v2170_v45 }
 0x978   :  { %v2093_v50 = vpop.permute.xlu0 %2092 }
 0x979   :  { %v2095_v51 = vmul.f32 %v3262_v49, %v2093_v50  ;;  %2198 = vrot.lane.b32.xlu1 %v2195_v48, %s3315_s29 }
 0x97b   :  { %2097 = vrot.lane.b32.xlu0 %v2095_v51, %s3315_s29 }
 0x97d   :  { %2155 = vrot.lane.b32.xlu1 %v2064_v47, %s3315_s29 }
 0x981   :  { %2127 = vrot.lane.b32.xlu1 %v2125_v43, %s3315_s29 }
 0x985   :  { %2182 = vrot.lane.b32.xlu1 %v2064_v47, %s3319_s27 }
 0x9eb   :  { %v2199_v52 = vpop.permute.xlu1 %2198 }
 0x9ec   :  { %2201 = vst.msk [vmem:[%s4185_s21] sm:$0xff] %vm1054_vm3, %v2199_v52  ;;  %3155 = vmatmul.mubr.msk.f32.vlgmr.msra.gmra.mxu1 %vm1054_vm3, %v2199_v52 }
 0x9ed   :  { %v2098_v56 = vpop.permute.xlu0 %2097 }
 0x9ee   :  { %v2100_v57 = vadd.f32 %v2098_v56, %v4047_v35 }
 0x9ef   :  { %v2156_v53 = vpop.permute.xlu1 %2155 }
 0x9f0   :  { %v2158_v54 = vmul.f32 %v3873_v28, %v2156_v53  ;;  %v2825_v28 = vld [vmem:[%s4176_s12] ss:$0 sm:$0xff] }
 0x9f2   :  { %2160 = vrot.lane.b32.xlu0 %v2158_v54, %s3315_s29 }
 0x9f3   :  { %v2128_v55 = vpop.permute.xlu1 %2127 }
 0x9f4   :  { %v2130_v36 = vadd.f32 %v2128_v55, %v3948_v24 }
 0x9f6   :  { %v2131_v37 = vmul.f32 %v2130_v36, %v2100_v57 }
 0x9f7   :  { %v2183_v60 = vpop.permute.xlu1 %2182 }
 0xa64   :  { %v2161_v58 = vpop.permute.xlu0 %2160 }
 0xa65   :  { %v2163_v59 = vadd.f32 %v2161_v58, %v3869_v22  ;;  %v2839_v22 = vcombine.high %v3489_v9, %v3509_v13 }
 0xa67   :  { %v2164_v47 = vmul.f32 %v2163_v59, %v2131_v37 }
 0xa69   :  { %v2185_v61 = vmul.f32 %v2183_v60, %v2164_v47 }
 0xa6b   :  { %2196 = vst.msk [vmem:[%s4186_s22] sm:$0xff] %vm1054_vm3, %v2185_v61 }
 0xaac   :  { %v2281_v62 = vpop.f32.mrf.mxu1 }
 0xaad   :  { %v2282_v24 = vadd.f32 %v2825_v28, %v2281_v62 }
 0xaae   :  { %v3156_v63 = vpop.f32.mrf.mxu1 }
 0xaaf   :  { %v2285_v35 = vmax.f32 %v2282_v24, 0.0 }
 0xab0   :  { %3309 = dma.done.wait [#allocation3], 2048 }
 0xab1   :  { %3310 = vsyncadd [#allocation3], 4294965248  ;;  %v2829_v20 = vcombine.high %v3444_v0, %v3464_v4  ;;  %v2831_v21 = vcombine.high %v3449_v1, %v3469_v5  ;;  %2444 = vmatprep.subr.bf16.mxu1 %v2837_v16  ;;  %2485 = vmatprep.subr.bf16.mxu0 %v2839_v22  ;;  %v2828_v23 = vcombine.low %v3444_v0, %v3464_v4  ;;  %v3322_v13 = vmov 0  }
 0xab2   :  { %2445 = vmatpush1.bf16.msra.mxu1 %v2836_v17  ;;  %2486 = vmatpush1.bf16.msra.mxu0 %v2838_v19  ;;  %v2830_v8 = vcombine.low %v3449_v1, %v3469_v5  ;;  %v2841_v9 = vcombine.high %v3494_v10, %v3514_v14  ;;  %v2843_v12 = vcombine.high %v3499_v11, %v3519_v15 }
 0xab3   :  { %2446 = vmatprep.subr.bf16.mxu1 %v2829_v20  ;;  %2487 = vmatprep.subr.bf16.mxu0 %v2831_v21  ;;  %v2290_v25 = vpack.c.bf16 %v2285_v35, %v2285_v35  ;;  %v2840_v0 = vcombine.low %v3494_v10, %v3514_v14  ;;  %v2842_v1 = vcombine.low %v3499_v11, %v3519_v15  ;;  %v2309_v14 = vlaneseq }
 0xab4   :  { %2464 = vmatprep.mubr.bf16.mxu1 %v3322_v13  ;;  %2505 = vmatprep.mubr.bf16.mxu0 %v3322_v13  ;;  %v2833_v4 = vcombine.high %v3454_v2, %v3474_v6  ;;  %v2835_v5 = vcombine.high %v3459_v3, %v3479_v7  ;;  %v2832_v10 = vcombine.low %v3454_v2, %v3474_v6  ;;  %v2307_v2 = vld [vmem:[%s4178_s14] sm:$0xff] }
 0xab5   :  { %v2834_v11 = vcombine.low %v3459_v3, %v3479_v7  ;;  %v2310_v15 = vshrl.u32 %v2309_v14, 7 }
 0xab6   :  { %2447 = vmatpush1.bf16.msra.mxu1 %v2828_v23  ;;  %2488 = vmatpush1.bf16.msra.mxu0 %v2830_v8 }
 0xab7   :  { %2526 = vmatprep.subr.bf16.mxu1 %v2841_v9  ;;  %2567 = vmatprep.subr.bf16.mxu0 %v2843_v12  ;;  %v2311_v26 = vsub.s32 0, %v2310_v15  ;;  %v2319_v27 = vsub.s32 2, %v2310_v15  ;;  %v2315_v6 = vsub.s32 1, %v2310_v15  ;;  %v2323_v3 = vsub.s32 3, %v2310_v15 }
 0xab8   :  { %v2327_v32 = vsub.s32 4, %v2310_v15  ;;  %v2335_v39 = vsub.s32 6, %v2310_v15  ;;  %v2331_v40 = vsub.s32 5, %v2310_v15  ;;  %v2339_v41 = vsub.s32 7, %v2310_v15 }
 0xab9   :  { %2844 = vmatmul.mubr.msk.bf16.vlgmr.msra.gmra.mxu1 %vm876_vm1, %v2290_v25  ;;  %2845 = vmatmul.mubr.msk.bf16.vlgmr.msra.gmra.mxu0 %vm876_vm1, %v2290_v25  ;;  %v2312_v7 = vrot.slane %v2307_v2, %v2311_v26  ;;  %v2320_v29 = vrot.slane %v2307_v2, %v2319_v27  ;;  %v2316_v30 = vrot.slane %v2307_v2, %v2315_v6 }
 0xaba   :  { %2527 = vmatpush1.bf16.msra.mxu1 %v2840_v0  ;;  %2568 = vmatpush1.bf16.msra.mxu0 %v2842_v1  ;;  %v2324_v38 = vrot.slane %v2307_v2, %v2323_v3  ;;  %v2328_v43 = vrot.slane %v2307_v2, %v2327_v32  ;;  %v2336_v54 = vrot.slane %v2307_v2, %v2335_v39 }
 0xabb   :  { %2528 = vmatprep.subr.bf16.mxu1 %v2833_v4  ;;  %2569 = vmatprep.subr.bf16.mxu0 %v2835_v5  ;;  %v2332_v36 = vrot.slane %v2307_v2, %v2331_v40  ;;  %v2340_v57 = vrot.slane %v2307_v2, %v2339_v41 }
 0xabc   :  { %2546 = vmatprep.mubr.bf16.mxu1 %v3322_v13  ;;  %2587 = vmatprep.mubr.bf16.mxu0 %v3322_v13 }
 0xabe   :  { %2529 = vmatpush1.bf16.msra.mxu1 %v2832_v10  ;;  %2570 = vmatpush1.bf16.msra.mxu0 %v2834_v11 }
 0xac1   :  { %2846 = vmatmul.mubr.msk.bf16.vlgmr.msra.gmra.mxu1 %vm876_vm1, %v2290_v25  ;;  %2847 = vmatmul.mubr.msk.bf16.vlgmr.msra.gmra.mxu0 %vm876_vm1, %v2290_v25 }
 0xb79   :  { %v2466_v46 = vpop.f32.mrf.mxu1  ;;  %v2507_v31 = vpop.f32.mrf.mxu0 }
 0xb7a   :  { %v2467_v33 = vadd.f32 %v2466_v46, %v2312_v7  ;;  %v2508_v44 = vadd.f32 %v2507_v31, %v2320_v29 }
 0xb7b   :  { %v2468_v34 = vpop.f32.mrf.mxu1  ;;  %v2509_v18 = vpop.f32.mrf.mxu0 }
 0xb7c   :  { %v2848_v42 = vmul.f32 -1.442695, %v2467_v33  ;;  %v2850_v45 = vmul.f32 -1.442695, %v2508_v44  ;;  %v2469_v48 = vadd.f32 %v2468_v34, %v2316_v30  ;;  %v2510_v49 = vadd.f32 %v2509_v18, %v2324_v38 }
 0xb7d   :  { %v2470_v50 = vpop.f32.mrf.mxu1  ;;  %v2511_v51 = vpop.f32.mrf.mxu0 }
 0xb7e   :  { %3263 = vpow2.f32 %v2848_v42  ;;  %v2849_v52 = vmul.f32 -1.442695, %v2469_v48  ;;  %v2851_v53 = vmul.f32 -1.442695, %v2510_v49 }
 0xb7f   :  { %3265 = vpow2.f32 %v2850_v45  ;;  %v2471_v55 = vpop.f32.mrf.mxu1  ;;  %v2512_v56 = vpop.f32.mrf.mxu0 }
 0xb80   :  { %3267 = vpow2.f32 %v2849_v52 }
 0xb81   :  { %3269 = vpow2.f32 %v2851_v53  ;;  %v2548_v58 = vpop.f32.mrf.mxu1  ;;  %v2589_v37 = vpop.f32.mrf.mxu0 }
 0xb82   :  { %v2549_v59 = vadd.f32 %v2548_v58, %v2328_v43  ;;  %v2590_v60 = vadd.f32 %v2589_v37, %v2336_v54 }
 0xb83   :  { %v2550_v47 = vpop.f32.mrf.mxu1  ;;  %v2591_v61 = vpop.f32.mrf.mxu0 }
 0xb84   :  { %v2852_v28 = vmul.f32 -1.442695, %v2549_v59  ;;  %v2854_v62 = vmul.f32 -1.442695, %v2590_v60  ;;  %v2551_v24 = vadd.f32 %v2550_v47, %v2332_v36  ;;  %v2592_v63 = vadd.f32 %v2591_v61, %v2340_v57 }
 0xb85   :  { %v2552_v35 = vpop.f32.mrf.mxu1  ;;  %v2593_v16 = vpop.f32.mrf.mxu0 }
 0xb86   :  { %3271 = vpow2.f32 %v2852_v28  ;;  %v2853_v22 = vmul.f32 -1.442695, %v2551_v24  ;;  %v2855_v17 = vmul.f32 -1.442695, %v2592_v63 }
 0xb87   :  { %3273 = vpow2.f32 %v2854_v62  ;;  %v2553_v19 = vpop.f32.mrf.mxu1  ;;  %v2594_v20 = vpop.f32.mrf.mxu0 }
 0xb88   :  { %3275 = vpow2.f32 %v2853_v22 }
 0xb89   :  { %3277 = vpow2.f32 %v2855_v17 }
 0xb8b   :  { %v3264_v21 = vpop.eup %3263 }
 0xb8c   :  { %v3266_v23 = vpop.eup %3265  ;;  %v2620_v8 = vadd.f32 1.0, %v3264_v21 }
 0xb8d   :  { %v3268_v9 = vpop.eup %3267  ;;  %v2622_v12 = vadd.f32 1.0, %v3266_v23 }
 0xb8e   :  { %v3270_v13 = vpop.eup %3269  ;;  %3279 = vrcp.f32 %v2620_v8  ;;  %v2621_v25 = vadd.f32 1.0, %v3268_v9 }
 0xb8f   :  { %3281 = vrcp.f32 %v2622_v12  ;;  %v2623_v0 = vadd.f32 1.0, %v3270_v13 }
 0xb90   :  { %3283 = vrcp.f32 %v2621_v25 }
 0xb91   :  { %3285 = vrcp.f32 %v2623_v0 }
 0xb93   :  { %v3272_v1 = vpop.eup %3271 }
 0xb94   :  { %v3274_v4 = vpop.eup %3273  ;;  %v2624_v5 = vadd.f32 1.0, %v3272_v1 }
 0xb95   :  { %v3276_v10 = vpop.eup %3275  ;;  %v2626_v11 = vadd.f32 1.0, %v3274_v4 }
 0xb96   :  { %v3278_v14 = vpop.eup %3277  ;;  %3287 = vrcp.f32 %v2624_v5  ;;  %v2625_v15 = vadd.f32 1.0, %v3276_v10 }
 0xb97   :  { %3289 = vrcp.f32 %v2626_v11  ;;  %v2627_v26 = vadd.f32 1.0, %v3278_v14 }
 0xb98   :  { %3291 = vrcp.f32 %v2625_v15 }
 0xb99   :  { %3293 = vrcp.f32 %v2627_v26 }
 0xb9b   :  { %v3280_v27 = vpop.eup %3279 }
 0xb9c   :  { %v3282_v2 = vpop.eup %3281  ;;  %v2644_v6 = vmul.f32 2.0, %v3280_v27 }
 0xb9d   :  { %v3284_v3 = vpop.eup %3283  ;;  %v2646_v7 = vmul.f32 2.0, %v3282_v2 }
 0xb9e   :  { %v3286_v29 = vpop.eup %3285  ;;  %v2856_v30 = vadd.f32 -1.0, %v2644_v6  ;;  %v2645_v38 = vmul.f32 2.0, %v3284_v3 }
 0xb9f   :  { %v2858_v46 = vadd.f32 -1.0, %v2646_v7  ;;  %v2647_v31 = vmul.f32 2.0, %v3286_v29 }
 0xba0   :  { %2660 = vst [vmem:[%s4184_s20] sm:$0xff] %v2856_v30  ;;  %v2857_v32 = vadd.f32 -1.0, %v2645_v38 }
 0xba1   :  { %2662 = vst [vmem:[%s4184_s20 + $0x10] sm:$0xff] %v2858_v46  ;;  %v2859_v33 = vadd.f32 -1.0, %v2647_v31 }
 0xba2   :  { %2661 = vst [vmem:[%s4184_s20 + $0x8] sm:$0xff] %v2857_v32 }
 0xba3   :  { %v3288_v44 = vpop.eup %3287  ;;  %2663 = vst [vmem:[%s4184_s20 + $0x18] sm:$0xff] %v2859_v33 }
 0xba4   :  { %v3290_v39 = vpop.eup %3289  ;;  %v2648_v34 = vmul.f32 2.0, %v3288_v44 }
 0xba5   :  { %v3292_v18 = vpop.eup %3291  ;;  %v2650_v40 = vmul.f32 2.0, %v3290_v39 }
 0xba6   :  { %v3294_v41 = vpop.eup %3293  ;;  %v2860_v42 = vadd.f32 -1.0, %v2648_v34  ;;  %v2649_v45 = vmul.f32 2.0, %v3292_v18 }
 0xba7   :  { %v2862_v48 = vadd.f32 -1.0, %v2650_v40  ;;  %v2651_v49 = vmul.f32 2.0, %v3294_v41 }
 0xba8   :  { %2664 = vst [vmem:[%s4184_s20 + $0x20] sm:$0xff] %v2860_v42  ;;  %v2861_v50 = vadd.f32 -1.0, %v2649_v45 }
 0xba9   :  { %2666 = vst [vmem:[%s4184_s20 + $0x30] sm:$0xff] %v2862_v48  ;;  %v2863_v51 = vadd.f32 -1.0, %v2651_v49 }
 0xbaa   :  { %2665 = vst [vmem:[%s4184_s20 + $0x28] sm:$0xff] %v2861_v50 }
 0xbab   :  { %2667 = vst [vmem:[%s4184_s20 + $0x38] sm:$0xff] %v2863_v51 }
 0xbac   :  { %2680 = vsyncpa [#allocation5], 1 }
 0xbad   :  { %2681 = vsyncmov [#allocation3] }
 0xbb0   :  { %s2682_s10 = vpop.sfrf %2681 }
 0xbb1   :  { %p2864_p5 = scmp.ne.s32.totalorder %s2682_s10, 0 }
 0xbb3   :  { %2686 = shalt.err (%p2864_p5)  }

</bundles_post_ra>
